<compile_context>
chip_gen: v7x
topology: tpu7x:2x2x1
jax: 0.10.0
libtpu: 0.0.40
codegen_flags: <defaults>
</compile_context>

<pallas_src>
import jax
import jax.numpy as jnp
from jax.experimental import pallas as pl
from jax.experimental.pallas import tpu as pltpu


def _round_up(x, m):
    return (x + m - 1) // m * m


def _vmem_capacity_bytes():
    """Trace-time VMEM capacity query with a conservative fallback."""
    try:
        return int(pltpu.get_tpu_info().vmem_capacity_bytes)
    except Exception:
        return 64 * 1024 * 1024  # assume the smallest (v7x-sized) VMEM


def _pick_images_per_block(n_images, cin_pad, s_seg, r_pad, vmem_budget):
    """Images per grid step: biggest group whose double-buffered footprint fits."""
    per_img = s_seg * (cin_pad * 2 + 2 * r_pad * 4)        # bf16 act + 2 f32 outputs
    resident = 2 * (9 * r_pad * cin_pad * 2                # w9 (double-buffered)
                    + 7 * r_pad * 4                        # bias + decode consts
                    + 2 * s_seg * 4)                       # gx / gy
    scratch = 4 * r_pad * s_seg * 4                        # acc / sigmoid / exp temps
    avail = max(vmem_budget - resident - scratch, 2 * per_img)
    k = max(1, avail // (2 * per_img))                     # x2: double buffering
    return int(min(k, n_images, 8))                        # cap trace-unroll size


def _make_yolo_kernel(shifts, k_img, r_pad, s_seg):
    """Kernel over one group of k_img images.

    xp_ref : (k_img, Cin_pad, S_seg) bf16  zero-padded image, col = y_p*Wp + x_p
    w_ref  : (9, R_pad, Cin_pad)     bf16  tap-major conv weights (row = f*A + a)
    b_ref  : (R_pad, 1)              f32   bias
    gx_ref : (1, S_seg)              f32   grid-x offset per padded column
    gy_ref : (1, S_seg)              f32   grid-y offset per padded column
    c_ref  : (5, R_pad, 1)           f32   [is_sig, is_exp, add_gx, add_gy, scale]
    out_ref: (R_pad, k_img*S_seg)    f32   [sig(x), sig(y), w, h, sig(conf)] rows
    box_ref: (R_pad, k_img*S_seg)    f32   [bx, by, bw, bh, sig(conf)] rows
    """

    def kernel(xp_ref, w_ref, b_ref, gx_ref, gy_ref, c_ref, out_ref, box_ref):
        is_sig = c_ref[0] > 0.5
        is_exp = c_ref[1] > 0.5
        add_gx = c_ref[2]
        add_gy = c_ref[3]
        scale = c_ref[4]
        bias = b_ref[...]
        gx = gx_ref[...]
        gy = gy_ref[...]
        for m in range(k_img):                              # static unrolled
            x = xp_ref[m]                                   # (Cin_pad, S_seg) bf16
            acc = jnp.zeros((r_pad, s_seg), jnp.float32)
            for t in range(9):                              # 3x3 taps, unrolled
                part = jnp.dot(w_ref[t], x, preferred_element_type=jnp.float32)
                # shift commutes with the matmul: roll the 16-row result, not X
                acc = acc + pltpu.roll(part, shift=shifts[t], axis=1)
            r = acc + bias
            s = jax.nn.sigmoid(r)
            # exp only contributes on w/h rows; clamp the rest to 0 -> no inf*0 NaN.
            # TODO(synk): restrict sigmoid/exp to 8-aligned row bands to halve EUP
            # work once the activation stream stops dominating.
            e = jnp.exp(jnp.where(is_exp, r, 0.0))
            lo, hi = m * s_seg, (m + 1) * s_seg
            out_ref[:, lo:hi] = jnp.where(is_sig, s, r)
            base = jnp.where(is_exp, e, s)
            box_ref[:, lo:hi] = (base + add_gx * gx + add_gy * gy) * scale

    return kernel


def yolo_layer_forward(x_nchw, conv_w, conv_b, anchors):
    """Pallas implementation of YOLOLayer.forward.

    x_nchw : (N, Cin, H, W) f32
    conv_w : (A*5, Cin, 3, 3) f32   (PyTorch Conv2d weight, channel o = a*5 + f)
    conv_b : (A*5,) f32
    anchors: (A, 2) f32

    Returns (output, boxes) matching the PyTorch module:
      output: (N, A, H, W, 5)
      boxes : (N, A*H*W, 5)
    """
    N, Cin, H, W = x_nchw.shape
    A = anchors.shape[0]
    R = 5 * A
    R_pad = _round_up(R, 8)
    Hp, Wp = H + 2, W + 2
    S_img = Hp * Wp
    S_seg = _round_up(S_img, 128)
    Cin_pad = _round_up(Cin, 16)

    vmem_cap = _vmem_capacity_bytes()
    k_img = _pick_images_per_block(N, Cin_pad, S_seg, R_pad,
                                   vmem_budget=int(vmem_cap * 0.4))
    N_pad = _round_up(N, k_img)
    # TODO(synk): for very large feature maps (per-image padded plane > VMEM
    # budget) band the rows with a manual 2-row-halo DMA instead of one whole
    # image per block.

    # --- activation: zero-pad spatial (+1 ring) & channels, flatten, cast bf16 ---
    xp = jnp.pad(x_nchw.astype(jnp.float32),
                 ((0, N_pad - N), (0, Cin_pad - Cin), (1, 1), (1, 1)))
    xp = xp.reshape(N_pad, Cin_pad, S_img)
    xp = jnp.pad(xp, ((0, 0), (0, 0), (0, S_seg - S_img))).astype(jnp.bfloat16)

    # --- conv weights: rows reordered to field-major (r = f*A + a), tap-major ---
    ridx = jnp.arange(R)
    f = ridx // A
    a = ridx % A
    perm = a * 5 + f
    wr = conv_w[perm]                                             # (R, Cin, 3, 3)
    w9 = jnp.transpose(wr, (2, 3, 0, 1)).reshape(9, R, Cin)       # (dy*3+dx, R, Cin)
    w9 = jnp.pad(w9, ((0, 0), (0, R_pad - R), (0, Cin_pad - Cin))).astype(jnp.bfloat16)
    b_f = jnp.pad(conv_b[perm], (0, R_pad - R)).reshape(R_pad, 1).astype(jnp.float32)

    # Tap t = dy*3 + dx needs input column c + (dy-1)*Wp + (dx-1); expressed as a
    # positive static lane-roll of the per-tap result.
    shifts = tuple(int((-((t // 3 - 1) * Wp + (t % 3 - 1))) % S_seg) for t in range(9))

    # --- per-row decode constants (field behaviour without in-kernel slicing) ---
    is_sig = ((f == 0) | (f == 1) | (f == 4)).astype(jnp.float32)
    is_exp = ((f == 2) | (f == 3)).astype(jnp.float32)
    add_gx = (f == 0).astype(jnp.float32)
    add_gy = (f == 1).astype(jnp.float32)
    aw = anchors[a, 0].astype(jnp.float32)
    ah = anchors[a, 1].astype(jnp.float32)
    scale = jnp.where(f == 0, 1.0 / W,
            jnp.where(f == 1, 1.0 / H,
            jnp.where(f == 2, aw,
            jnp.where(f == 3, ah, 1.0))))
    consts = jnp.stack([is_sig, is_exp, add_gx, add_gy, scale], axis=0)
    consts = jnp.pad(consts, ((0, 0), (0, R_pad - R)))
    consts = consts.reshape(5, R_pad, 1).astype(jnp.float32)

    # --- grid offsets per padded column (same for every image; VMEM-resident) ---
    loc = jnp.arange(S_img, dtype=jnp.int32)
    gx = jnp.pad((loc % Wp - 1).astype(jnp.float32), (0, S_seg - S_img)).reshape(1, S_seg)
    gy = jnp.pad((loc // Wp - 1).astype(jnp.float32), (0, S_seg - S_img)).reshape(1, S_seg)

    kernel = _make_yolo_kernel(shifts, k_img, R_pad, S_seg)
    out_k, box_k = pl.pallas_call(
        kernel,
        out_shape=(
            jax.ShapeDtypeStruct((R_pad, N_pad * S_seg), jnp.float32),
            jax.ShapeDtypeStruct((R_pad, N_pad * S_seg), jnp.float32),
        ),
        grid=(N_pad // k_img,),
        in_specs=[
            pl.BlockSpec((k_img, Cin_pad, S_seg), lambda j: (j, 0, 0)),
            # Constant index_maps -> fetched once, resident across grid steps.
            # TODO(synk): single-buffer these via pipeline_mode=pl.Buffered(1)
            # once verified, to free VMEM headroom on v7x.
            pl.BlockSpec((9, R_pad, Cin_pad), lambda j: (0, 0, 0)),
            pl.BlockSpec((R_pad, 1), lambda j: (0, 0)),
            pl.BlockSpec((1, S_seg), lambda j: (0, 0)),
            pl.BlockSpec((1, S_seg), lambda j: (0, 0)),
            pl.BlockSpec((5, R_pad, 1), lambda j: (0, 0, 0)),
        ],
        out_specs=(
            pl.BlockSpec((R_pad, k_img * S_seg), lambda j: (0, j)),
            pl.BlockSpec((R_pad, k_img * S_seg), lambda j: (0, j)),
        ),
        compiler_params=pltpu.CompilerParams(
            # TODO(synk): use pltpu.CORE_PARALLEL on v7x to shard image groups
            # across both TensorCores (kept "parallel" for portability here).
            dimension_semantics=("parallel",),
            vmem_limit_bytes=int(min(vmem_cap * 3 // 4, 100 * 1024 * 1024)),
        ),
    )(xp, w9, b_f, gx, gy, consts)

    # --- back to PyTorch shapes (pure glue; a fused consumer should read the
    # lane-major (R, cols) layout directly instead of paying these copies). ---
    def unpack(z):
        z = z[:R].reshape(5, A, N_pad, S_seg)[:, :, :N, :S_img]
        z = z.reshape(5, A, N, Hp, Wp)[:, :, :, 1:H + 1, 1:W + 1]
        return z.transpose(2, 1, 3, 4, 0)                      # (N, A, H, W, 5)

    output = unpack(out_k)
    boxes = unpack(box_k).reshape(N, A * H * W, 5)
    return output, boxes


def yolo_layer_ref(x_nchw, conv_w, conv_b, anchors):
    """Pure-JAX f32 reference mirroring the PyTorch forward (correctness check)."""
    N, Cin, H, W = x_nchw.shape
    A = anchors.shape[0]
    xpad = jnp.pad(x_nchw, ((0, 0), (0, 0), (1, 1), (1, 1)))
    conv = jax.lax.conv_general_dilated(
        xpad, conv_w, window_strides=(1, 1), padding="VALID",
        dimension_numbers=("NCHW", "OIHW", "NCHW"),
        precision=jax.lax.Precision.HIGHEST,
    ) + conv_b.reshape(1, -1, 1, 1)
    pred = conv.reshape(N, A, 5, H, W).transpose(0, 1, 3, 4, 2)           # (N,A,H,W,5)
    xs = jax.nn.sigmoid(pred[..., 0])
    ys = jax.nn.sigmoid(pred[..., 1])
    w_ = pred[..., 2]
    h_ = pred[..., 3]
    conf = jax.nn.sigmoid(pred[..., 4:5])
    gx = jnp.arange(W, dtype=jnp.float32).reshape(1, 1, 1, W)
    gy = jnp.arange(H, dtype=jnp.float32).reshape(1, 1, H, 1)
    aw = anchors[:, 0].reshape(1, A, 1, 1)
    ah = anchors[:, 1].reshape(1, A, 1, 1)
    bx = (xs + gx) / W
    by = (ys + gy) / H
    bw = jnp.exp(w_) * aw
    bh = jnp.exp(h_) * ah
    output = jnp.concatenate(
        [xs[..., None], ys[..., None], w_[..., None], h_[..., None], conf], -1)
    boxes = jnp.concatenate(
        [bx[..., None], by[..., None], bw[..., None], bh[..., None], conf], -1)
    return output, boxes.reshape(N, -1, 5)


if __name__ == "__main__":
    # Small, deterministic setup consistent with YOLOLayer(anchors, places, stride)
    N, PLACES, H, W = 2, 4, 16, 16
    anchors = jnp.array([[1.25, 1.625], [2.0, 3.75], [4.125, 2.875]], dtype=jnp.float32)
    A = anchors.shape[0]
    # stride = 8  # module attribute, unused by forward()

    key = jax.random.PRNGKey(0)
    kx, kw, kb = jax.random.split(key, 3)
    x = jax.random.normal(kx, (N, PLACES, H, W), dtype=jnp.float32)
    conv_w = 0.1 * jax.random.normal(kw, (A * 5, PLACES, 3, 3), dtype=jnp.float32)
    conv_b = 0.05 * jax.random.normal(kb, (A * 5,), dtype=jnp.float32)

    output, boxes = yolo_layer_forward(x, conv_w, conv_b, anchors)
    output, boxes = jax.block_until_ready((output, boxes))

    ref_output, ref_boxes = yolo_layer_ref(x, conv_w, conv_b, anchors)
    assert output.shape == (N, A, H, W, 5)
    assert boxes.shape == (N, A * H * W, 5)
    # Tolerance covers bf16 matmul operands (f32 accumulation) vs f32 reference.
    assert jnp.allclose(output, ref_output, atol=2e-2, rtol=2e-2)
    assert jnp.allclose(boxes, ref_boxes, atol=2e-2, rtol=2e-2)

    print("KERNEL_OK")
</pallas_src>

<mosaic_0001>
module attributes {stable_mosaic.version = 11 : i64} {
  func.func @kernel(%arg0: i32, %arg1: memref<2x16x384xbf16, #tpu.memory_space<vmem>>, %arg2: memref<9x16x16xbf16, #tpu.memory_space<vmem>>, %arg3: memref<16x1xf32, #tpu.memory_space<vmem>>, %arg4: memref<1x384xf32, #tpu.memory_space<vmem>>, %arg5: memref<1x384xf32, #tpu.memory_space<vmem>>, %arg6: memref<5x16x1xf32, #tpu.memory_space<vmem>>, %arg7: memref<16x768xf32, #tpu.memory_space<vmem>>, %arg8: memref<16x768xf32, #tpu.memory_space<vmem>>) attributes {dimension_semantics = [#tpu.dimension_semantics<parallel>], iteration_bounds = array<i64: 1>, scalar_prefetch = 0 : i64, scratch_operands = 0 : i64, tpu.core_type = #tpu.core_type<tc>, window_params = [{transform_indices = @transform_0, window_bounds = array<i64: 2, 16, 384>}, {pipeline_mode = #tpu.pipeline_mode<synchronous>, transform_indices = @transform_1, window_bounds = array<i64: 9, 16, 16>}, {pipeline_mode = #tpu.pipeline_mode<synchronous>, transform_indices = @transform_2, window_bounds = array<i64: 16, 1>}, {pipeline_mode = #tpu.pipeline_mode<synchronous>, transform_indices = @transform_3, window_bounds = array<i64: 1, 384>}, {pipeline_mode = #tpu.pipeline_mode<synchronous>, transform_indices = @transform_4, window_bounds = array<i64: 1, 384>}, {pipeline_mode = #tpu.pipeline_mode<synchronous>, transform_indices = @transform_5, window_bounds = array<i64: 5, 16, 1>}, {transform_indices = @transform_6, window_bounds = array<i64: 16, 768>}, {transform_indices = @transform_7, window_bounds = array<i64: 16, 768>}]} {
    %c0 = arith.constant 0 : index
    %c0_0 = arith.constant 0 : index
    %c0_1 = arith.constant 0 : index
    %0 = vector.load %arg6[%c0, %c0_0, %c0_1] : memref<5x16x1xf32, #tpu.memory_space<vmem>>, vector<1x16x1xf32>
    %1 = vector.shape_cast %0 : vector<1x16x1xf32> to vector<16x1xf32>
    %cst = arith.constant 5.000000e-01 : f32
    %2 = vector.broadcast %cst : f32 to vector<16x1xf32>
    %3 = arith.cmpf ogt, %1, %2 : vector<16x1xf32>
    %c1 = arith.constant 1 : index
    %c0_2 = arith.constant 0 : index
    %c0_3 = arith.constant 0 : index
    %4 = vector.load %arg6[%c1, %c0_2, %c0_3] : memref<5x16x1xf32, #tpu.memory_space<vmem>>, vector<1x16x1xf32>
    %5 = vector.shape_cast %4 : vector<1x16x1xf32> to vector<16x1xf32>
    %cst_4 = arith.constant 5.000000e-01 : f32
    %6 = vector.broadcast %cst_4 : f32 to vector<16x1xf32>
    %7 = arith.cmpf ogt, %5, %6 : vector<16x1xf32>
    %c2 = arith.constant 2 : index
    %c0_5 = arith.constant 0 : index
    %c0_6 = arith.constant 0 : index
    %8 = vector.load %arg6[%c2, %c0_5, %c0_6] : memref<5x16x1xf32, #tpu.memory_space<vmem>>, vector<1x16x1xf32>
    %9 = vector.shape_cast %8 : vector<1x16x1xf32> to vector<16x1xf32>
    %c3 = arith.constant 3 : index
    %c0_7 = arith.constant 0 : index
    %c0_8 = arith.constant 0 : index
    %10 = vector.load %arg6[%c3, %c0_7, %c0_8] : memref<5x16x1xf32, #tpu.memory_space<vmem>>, vector<1x16x1xf32>
    %11 = vector.shape_cast %10 : vector<1x16x1xf32> to vector<16x1xf32>
    %c4 = arith.constant 4 : index
    %c0_9 = arith.constant 0 : index
    %c0_10 = arith.constant 0 : index
    %12 = vector.load %arg6[%c4, %c0_9, %c0_10] : memref<5x16x1xf32, #tpu.memory_space<vmem>>, vector<1x16x1xf32>
    %13 = vector.shape_cast %12 : vector<1x16x1xf32> to vector<16x1xf32>
    %c0_11 = arith.constant 0 : index
    %c0_12 = arith.constant 0 : index
    %14 = vector.load %arg3[%c0_11, %c0_12] : memref<16x1xf32, #tpu.memory_space<vmem>>, vector<16x1xf32>
    %c0_13 = arith.constant 0 : index
    %c0_14 = arith.constant 0 : index
    %15 = vector.load %arg4[%c0_13, %c0_14] : memref<1x384xf32, #tpu.memory_space<vmem>>, vector<1x384xf32>
    %c0_15 = arith.constant 0 : index
    %c0_16 = arith.constant 0 : index
    %16 = vector.load %arg5[%c0_15, %c0_16] : memref<1x384xf32, #tpu.memory_space<vmem>>, vector<1x384xf32>
    %c0_17 = arith.constant 0 : index
    %c0_18 = arith.constant 0 : index
    %c0_19 = arith.constant 0 : index
    %17 = vector.load %arg1[%c0_17, %c0_18, %c0_19] : memref<2x16x384xbf16, #tpu.memory_space<vmem>>, vector<1x16x384xbf16>
    %18 = vector.shape_cast %17 : vector<1x16x384xbf16> to vector<16x384xbf16>
    %cst_20 = arith.constant 0.000000e+00 : f32
    %19 = vector.broadcast %cst_20 : f32 to vector<16x384xf32>
    %c0_21 = arith.constant 0 : index
    %c0_22 = arith.constant 0 : index
    %c0_23 = arith.constant 0 : index
    %20 = vector.load %arg2[%c0_21, %c0_22, %c0_23] : memref<9x16x16xbf16, #tpu.memory_space<vmem>>, vector<1x16x16xbf16>
    %21 = vector.shape_cast %20 : vector<1x16x16xbf16> to vector<16x16xbf16>
    %cst_24 = arith.constant dense<0.000000e+00> : vector<16x384xf32>
    %22 = tpu.matmul %21, %18, %cst_24 {dimension_numbers = #tpu.dot_dimension_numbers<[1], [0], [0], [1], [0, 0, 1, 1], [], []>} : vector<16x16xbf16>, vector<16x384xbf16>, vector<16x384xf32> -> vector<16x384xf32>
    %c19_i32 = arith.constant 19 : i32
    %23 = tpu.dynamic_rotate %22 by %c19_i32 dim 1 : vector<16x384xf32>, i32 -> vector<16x384xf32>
    %24 = arith.addf %19, %23 : vector<16x384xf32>
    %c1_25 = arith.constant 1 : index
    %c0_26 = arith.constant 0 : index
    %c0_27 = arith.constant 0 : index
    %25 = vector.load %arg2[%c1_25, %c0_26, %c0_27] : memref<9x16x16xbf16, #tpu.memory_space<vmem>>, vector<1x16x16xbf16>
    %26 = vector.shape_cast %25 : vector<1x16x16xbf16> to vector<16x16xbf16>
    %cst_28 = arith.constant dense<0.000000e+00> : vector<16x384xf32>
    %27 = tpu.matmul %26, %18, %cst_28 {dimension_numbers = #tpu.dot_dimension_numbers<[1], [0], [0], [1], [0, 0, 1, 1], [], []>} : vector<16x16xbf16>, vector<16x384xbf16>, vector<16x384xf32> -> vector<16x384xf32>
    %c18_i32 = arith.constant 18 : i32
    %28 = tpu.dynamic_rotate %27 by %c18_i32 dim 1 : vector<16x384xf32>, i32 -> vector<16x384xf32>
    %29 = arith.addf %24, %28 : vector<16x384xf32>
    %c2_29 = arith.constant 2 : index
    %c0_30 = arith.constant 0 : index
    %c0_31 = arith.constant 0 : index
    %30 = vector.load %arg2[%c2_29, %c0_30, %c0_31] : memref<9x16x16xbf16, #tpu.memory_space<vmem>>, vector<1x16x16xbf16>
    %31 = vector.shape_cast %30 : vector<1x16x16xbf16> to vector<16x16xbf16>
    %cst_32 = arith.constant dense<0.000000e+00> : vector<16x384xf32>
    %32 = tpu.matmul %31, %18, %cst_32 {dimension_numbers = #tpu.dot_dimension_numbers<[1], [0], [0], [1], [0, 0, 1, 1], [], []>} : vector<16x16xbf16>, vector<16x384xbf16>, vector<16x384xf32> -> vector<16x384xf32>
    %c17_i32 = arith.constant 17 : i32
    %33 = tpu.dynamic_rotate %32 by %c17_i32 dim 1 : vector<16x384xf32>, i32 -> vector<16x384xf32>
    %34 = arith.addf %29, %33 : vector<16x384xf32>
    %c3_33 = arith.constant 3 : index
    %c0_34 = arith.constant 0 : index
    %c0_35 = arith.constant 0 : index
    %35 = vector.load %arg2[%c3_33, %c0_34, %c0_35] : memref<9x16x16xbf16, #tpu.memory_space<vmem>>, vector<1x16x16xbf16>
    %36 = vector.shape_cast %35 : vector<1x16x16xbf16> to vector<16x16xbf16>
    %cst_36 = arith.constant dense<0.000000e+00> : vector<16x384xf32>
    %37 = tpu.matmul %36, %18, %cst_36 {dimension_numbers = #tpu.dot_dimension_numbers<[1], [0], [0], [1], [0, 0, 1, 1], [], []>} : vector<16x16xbf16>, vector<16x384xbf16>, vector<16x384xf32> -> vector<16x384xf32>
    %c1_i32 = arith.constant 1 : i32
    %38 = tpu.dynamic_rotate %37 by %c1_i32 dim 1 : vector<16x384xf32>, i32 -> vector<16x384xf32>
    %39 = arith.addf %34, %38 : vector<16x384xf32>
    %c4_37 = arith.constant 4 : index
    %c0_38 = arith.constant 0 : index
    %c0_39 = arith.constant 0 : index
    %40 = vector.load %arg2[%c4_37, %c0_38, %c0_39] : memref<9x16x16xbf16, #tpu.memory_space<vmem>>, vector<1x16x16xbf16>
    %41 = vector.shape_cast %40 : vector<1x16x16xbf16> to vector<16x16xbf16>
    %cst_40 = arith.constant dense<0.000000e+00> : vector<16x384xf32>
    %42 = tpu.matmul %41, %18, %cst_40 {dimension_numbers = #tpu.dot_dimension_numbers<[1], [0], [0], [1], [0, 0, 1, 1], [], []>} : vector<16x16xbf16>, vector<16x384xbf16>, vector<16x384xf32> -> vector<16x384xf32>
    %c0_i32 = arith.constant 0 : i32
    %43 = tpu.dynamic_rotate %42 by %c0_i32 dim 1 : vector<16x384xf32>, i32 -> vector<16x384xf32>
    %44 = arith.addf %39, %43 : vector<16x384xf32>
    %c5 = arith.constant 5 : index
    %c0_41 = arith.constant 0 : index
    %c0_42 = arith.constant 0 : index
    %45 = vector.load %arg2[%c5, %c0_41, %c0_42] : memref<9x16x16xbf16, #tpu.memory_space<vmem>>, vector<1x16x16xbf16>
    %46 = vector.shape_cast %45 : vector<1x16x16xbf16> to vector<16x16xbf16>
    %cst_43 = arith.constant dense<0.000000e+00> : vector<16x384xf32>
    %47 = tpu.matmul %46, %18, %cst_43 {dimension_numbers = #tpu.dot_dimension_numbers<[1], [0], [0], [1], [0, 0, 1, 1], [], []>} : vector<16x16xbf16>, vector<16x384xbf16>, vector<16x384xf32> -> vector<16x384xf32>
    %c383_i32 = arith.constant 383 : i32
    %48 = tpu.dynamic_rotate %47 by %c383_i32 dim 1 : vector<16x384xf32>, i32 -> vector<16x384xf32>
    %49 = arith.addf %44, %48 : vector<16x384xf32>
    %c6 = arith.constant 6 : index
    %c0_44 = arith.constant 0 : index
    %c0_45 = arith.constant 0 : index
    %50 = vector.load %arg2[%c6, %c0_44, %c0_45] : memref<9x16x16xbf16, #tpu.memory_space<vmem>>, vector<1x16x16xbf16>
    %51 = vector.shape_cast %50 : vector<1x16x16xbf16> to vector<16x16xbf16>
    %cst_46 = arith.constant dense<0.000000e+00> : vector<16x384xf32>
    %52 = tpu.matmul %51, %18, %cst_46 {dimension_numbers = #tpu.dot_dimension_numbers<[1], [0], [0], [1], [0, 0, 1, 1], [], []>} : vector<16x16xbf16>, vector<16x384xbf16>, vector<16x384xf32> -> vector<16x384xf32>
    %c367_i32 = arith.constant 367 : i32
    %53 = tpu.dynamic_rotate %52 by %c367_i32 dim 1 : vector<16x384xf32>, i32 -> vector<16x384xf32>
    %54 = arith.addf %49, %53 : vector<16x384xf32>
    %c7 = arith.constant 7 : index
    %c0_47 = arith.constant 0 : index
    %c0_48 = arith.constant 0 : index
    %55 = vector.load %arg2[%c7, %c0_47, %c0_48] : memref<9x16x16xbf16, #tpu.memory_space<vmem>>, vector<1x16x16xbf16>
    %56 = vector.shape_cast %55 : vector<1x16x16xbf16> to vector<16x16xbf16>
    %cst_49 = arith.constant dense<0.000000e+00> : vector<16x384xf32>
    %57 = tpu.matmul %56, %18, %cst_49 {dimension_numbers = #tpu.dot_dimension_numbers<[1], [0], [0], [1], [0, 0, 1, 1], [], []>} : vector<16x16xbf16>, vector<16x384xbf16>, vector<16x384xf32> -> vector<16x384xf32>
    %c366_i32 = arith.constant 366 : i32
    %58 = tpu.dynamic_rotate %57 by %c366_i32 dim 1 : vector<16x384xf32>, i32 -> vector<16x384xf32>
    %59 = arith.addf %54, %58 : vector<16x384xf32>
    %c8 = arith.constant 8 : index
    %c0_50 = arith.constant 0 : index
    %c0_51 = arith.constant 0 : index
    %60 = vector.load %arg2[%c8, %c0_50, %c0_51] : memref<9x16x16xbf16, #tpu.memory_space<vmem>>, vector<1x16x16xbf16>
    %61 = vector.shape_cast %60 : vector<1x16x16xbf16> to vector<16x16xbf16>
    %cst_52 = arith.constant dense<0.000000e+00> : vector<16x384xf32>
    %62 = tpu.matmul %61, %18, %cst_52 {dimension_numbers = #tpu.dot_dimension_numbers<[1], [0], [0], [1], [0, 0, 1, 1], [], []>} : vector<16x16xbf16>, vector<16x384xbf16>, vector<16x384xf32> -> vector<16x384xf32>
    %c365_i32 = arith.constant 365 : i32
    %63 = tpu.dynamic_rotate %62 by %c365_i32 dim 1 : vector<16x384xf32>, i32 -> vector<16x384xf32>
    %64 = arith.addf %59, %63 : vector<16x384xf32>
    %65 = vector.broadcast %14 : vector<16x1xf32> to vector<16x384xf32>
    %66 = arith.addf %64, %65 : vector<16x384xf32>
    %67 = arith.negf %66 : vector<16x384xf32>
    %68 = math.exp %67 : vector<16x384xf32>
    %cst_53 = arith.constant 1.000000e+00 : f32
    %69 = vector.broadcast %cst_53 : f32 to vector<16x384xf32>
    %70 = arith.addf %69, %68 : vector<16x384xf32>
    %71 = arith.divf %69, %70 : vector<16x384xf32>
    %cst_54 = arith.constant 0.000000e+00 : f32
    %72 = vector.shape_cast %7 : vector<16x1xi1> to vector<16x1xi1>
    %73 = vector.broadcast %72 : vector<16x1xi1> to vector<16x384xi1>
    %74 = vector.broadcast %cst_54 : f32 to vector<16x384xf32>
    %75 = arith.select %73, %66, %74 : vector<16x384xi1>, vector<16x384xf32>
    %76 = math.exp %75 : vector<16x384xf32>
    %77 = vector.shape_cast %3 : vector<16x1xi1> to vector<16x1xi1>
    %78 = vector.broadcast %77 : vector<16x1xi1> to vector<16x384xi1>
    %79 = arith.select %78, %71, %66 : vector<16x384xi1>, vector<16x384xf32>
    %c0_55 = arith.constant 0 : index
    %c0_56 = arith.constant 0 : index
    %80 = vector.load %arg7[%c0_55, %c0_56] : memref<16x768xf32, #tpu.memory_space<vmem>>, vector<16x384xf32>
    tpu.vector_store %arg7[%c0_55, %c0_56], %79 {strides = array<i32>} : memref<16x768xf32, #tpu.memory_space<vmem>>, vector<16x384xf32>,
    %81 = vector.shape_cast %7 : vector<16x1xi1> to vector<16x1xi1>
    %82 = vector.broadcast %81 : vector<16x1xi1> to vector<16x384xi1>
    %83 = arith.select %82, %76, %71 : vector<16x384xi1>, vector<16x384xf32>
    %84 = vector.broadcast %9 : vector<16x1xf32> to vector<16x384xf32>
    %85 = vector.broadcast %15 : vector<1x384xf32> to vector<16x384xf32>
    %86 = arith.mulf %84, %85 : vector<16x384xf32>
    %87 = arith.addf %83, %86 : vector<16x384xf32>
    %88 = vector.broadcast %11 : vector<16x1xf32> to vector<16x384xf32>
    %89 = vector.broadcast %16 : vector<1x384xf32> to vector<16x384xf32>
    %90 = arith.mulf %88, %89 : vector<16x384xf32>
    %91 = arith.addf %87, %90 : vector<16x384xf32>
    %92 = vector.broadcast %13 : vector<16x1xf32> to vector<16x384xf32>
    %93 = arith.mulf %91, %92 : vector<16x384xf32>
    %c0_57 = arith.constant 0 : index
    %c0_58 = arith.constant 0 : index
    %94 = vector.load %arg8[%c0_57, %c0_58] : memref<16x768xf32, #tpu.memory_space<vmem>>, vector<16x384xf32>
    tpu.vector_store %arg8[%c0_57, %c0_58], %93 {strides = array<i32>} : memref<16x768xf32, #tpu.memory_space<vmem>>, vector<16x384xf32>,
    %c1_59 = arith.constant 1 : index
    %c0_60 = arith.constant 0 : index
    %c0_61 = arith.constant 0 : index
    %95 = vector.load %arg1[%c1_59, %c0_60, %c0_61] : memref<2x16x384xbf16, #tpu.memory_space<vmem>>, vector<1x16x384xbf16>
    %96 = vector.shape_cast %95 : vector<1x16x384xbf16> to vector<16x384xbf16>
    %cst_62 = arith.constant 0.000000e+00 : f32
    %97 = vector.broadcast %cst_62 : f32 to vector<16x384xf32>
    %c0_63 = arith.constant 0 : index
    %c0_64 = arith.constant 0 : index
    %c0_65 = arith.constant 0 : index
    %98 = vector.load %arg2[%c0_63, %c0_64, %c0_65] : memref<9x16x16xbf16, #tpu.memory_space<vmem>>, vector<1x16x16xbf16>
    %99 = vector.shape_cast %98 : vector<1x16x16xbf16> to vector<16x16xbf16>
    %cst_66 = arith.constant dense<0.000000e+00> : vector<16x384xf32>
    %100 = tpu.matmul %99, %96, %cst_66 {dimension_numbers = #tpu.dot_dimension_numbers<[1], [0], [0], [1], [0, 0, 1, 1], [], []>} : vector<16x16xbf16>, vector<16x384xbf16>, vector<16x384xf32> -> vector<16x384xf32>
    %c19_i32_67 = arith.constant 19 : i32
    %101 = tpu.dynamic_rotate %100 by %c19_i32_67 dim 1 : vector<16x384xf32>, i32 -> vector<16x384xf32>
    %102 = arith.addf %97, %101 : vector<16x384xf32>
    %c1_68 = arith.constant 1 : index
    %c0_69 = arith.constant 0 : index
    %c0_70 = arith.constant 0 : index
    %103 = vector.load %arg2[%c1_68, %c0_69, %c0_70] : memref<9x16x16xbf16, #tpu.memory_space<vmem>>, vector<1x16x16xbf16>
    %104 = vector.shape_cast %103 : vector<1x16x16xbf16> to vector<16x16xbf16>
    %cst_71 = arith.constant dense<0.000000e+00> : vector<16x384xf32>
    %105 = tpu.matmul %104, %96, %cst_71 {dimension_numbers = #tpu.dot_dimension_numbers<[1], [0], [0], [1], [0, 0, 1, 1], [], []>} : vector<16x16xbf16>, vector<16x384xbf16>, vector<16x384xf32> -> vector<16x384xf32>
    %c18_i32_72 = arith.constant 18 : i32
    %106 = tpu.dynamic_rotate %105 by %c18_i32_72 dim 1 : vector<16x384xf32>, i32 -> vector<16x384xf32>
    %107 = arith.addf %102, %106 : vector<16x384xf32>
    %c2_73 = arith.constant 2 : index
    %c0_74 = arith.constant 0 : index
    %c0_75 = arith.constant 0 : index
    %108 = vector.load %arg2[%c2_73, %c0_74, %c0_75] : memref<9x16x16xbf16, #tpu.memory_space<vmem>>, vector<1x16x16xbf16>
    %109 = vector.shape_cast %108 : vector<1x16x16xbf16> to vector<16x16xbf16>
    %cst_76 = arith.constant dense<0.000000e+00> : vector<16x384xf32>
    %110 = tpu.matmul %109, %96, %cst_76 {dimension_numbers = #tpu.dot_dimension_numbers<[1], [0], [0], [1], [0, 0, 1, 1], [], []>} : vector<16x16xbf16>, vector<16x384xbf16>, vector<16x384xf32> -> vector<16x384xf32>
    %c17_i32_77 = arith.constant 17 : i32
    %111 = tpu.dynamic_rotate %110 by %c17_i32_77 dim 1 : vector<16x384xf32>, i32 -> vector<16x384xf32>
    %112 = arith.addf %107, %111 : vector<16x384xf32>
    %c3_78 = arith.constant 3 : index
    %c0_79 = arith.constant 0 : index
    %c0_80 = arith.constant 0 : index
    %113 = vector.load %arg2[%c3_78, %c0_79, %c0_80] : memref<9x16x16xbf16, #tpu.memory_space<vmem>>, vector<1x16x16xbf16>
    %114 = vector.shape_cast %113 : vector<1x16x16xbf16> to vector<16x16xbf16>
    %cst_81 = arith.constant dense<0.000000e+00> : vector<16x384xf32>
    %115 = tpu.matmul %114, %96, %cst_81 {dimension_numbers = #tpu.dot_dimension_numbers<[1], [0], [0], [1], [0, 0, 1, 1], [], []>} : vector<16x16xbf16>, vector<16x384xbf16>, vector<16x384xf32> -> vector<16x384xf32>
    %c1_i32_82 = arith.constant 1 : i32
    %116 = tpu.dynamic_rotate %115 by %c1_i32_82 dim 1 : vector<16x384xf32>, i32 -> vector<16x384xf32>
    %117 = arith.addf %112, %116 : vector<16x384xf32>
    %c4_83 = arith.constant 4 : index
    %c0_84 = arith.constant 0 : index
    %c0_85 = arith.constant 0 : index
    %118 = vector.load %arg2[%c4_83, %c0_84, %c0_85] : memref<9x16x16xbf16, #tpu.memory_space<vmem>>, vector<1x16x16xbf16>
    %119 = vector.shape_cast %118 : vector<1x16x16xbf16> to vector<16x16xbf16>
    %cst_86 = arith.constant dense<0.000000e+00> : vector<16x384xf32>
    %120 = tpu.matmul %119, %96, %cst_86 {dimension_numbers = #tpu.dot_dimension_numbers<[1], [0], [0], [1], [0, 0, 1, 1], [], []>} : vector<16x16xbf16>, vector<16x384xbf16>, vector<16x384xf32> -> vector<16x384xf32>
    %c0_i32_87 = arith.constant 0 : i32
    %121 = tpu.dynamic_rotate %120 by %c0_i32_87 dim 1 : vector<16x384xf32>, i32 -> vector<16x384xf32>
    %122 = arith.addf %117, %121 : vector<16x384xf32>
    %c5_88 = arith.constant 5 : index
    %c0_89 = arith.constant 0 : index
    %c0_90 = arith.constant 0 : index
    %123 = vector.load %arg2[%c5_88, %c0_89, %c0_90] : memref<9x16x16xbf16, #tpu.memory_space<vmem>>, vector<1x16x16xbf16>
    %124 = vector.shape_cast %123 : vector<1x16x16xbf16> to vector<16x16xbf16>
    %cst_91 = arith.constant dense<0.000000e+00> : vector<16x384xf32>
    %125 = tpu.matmul %124, %96, %cst_91 {dimension_numbers = #tpu.dot_dimension_numbers<[1], [0], [0], [1], [0, 0, 1, 1], [], []>} : vector<16x16xbf16>, vector<16x384xbf16>, vector<16x384xf32> -> vector<16x384xf32>
    %c383_i32_92 = arith.constant 383 : i32
    %126 = tpu.dynamic_rotate %125 by %c383_i32_92 dim 1 : vector<16x384xf32>, i32 -> vector<16x384xf32>
    %127 = arith.addf %122, %126 : vector<16x384xf32>
    %c6_93 = arith.constant 6 : index
    %c0_94 = arith.constant 0 : index
    %c0_95 = arith.constant 0 : index
    %128 = vector.load %arg2[%c6_93, %c0_94, %c0_95] : memref<9x16x16xbf16, #tpu.memory_space<vmem>>, vector<1x16x16xbf16>
    %129 = vector.shape_cast %128 : vector<1x16x16xbf16> to vector<16x16xbf16>
    %cst_96 = arith.constant dense<0.000000e+00> : vector<16x384xf32>
    %130 = tpu.matmul %129, %96, %cst_96 {dimension_numbers = #tpu.dot_dimension_numbers<[1], [0], [0], [1], [0, 0, 1, 1], [], []>} : vector<16x16xbf16>, vector<16x384xbf16>, vector<16x384xf32> -> vector<16x384xf32>
    %c367_i32_97 = arith.constant 367 : i32
    %131 = tpu.dynamic_rotate %130 by %c367_i32_97 dim 1 : vector<16x384xf32>, i32 -> vector<16x384xf32>
    %132 = arith.addf %127, %131 : vector<16x384xf32>
    %c7_98 = arith.constant 7 : index
    %c0_99 = arith.constant 0 : index
    %c0_100 = arith.constant 0 : index
    %133 = vector.load %arg2[%c7_98, %c0_99, %c0_100] : memref<9x16x16xbf16, #tpu.memory_space<vmem>>, vector<1x16x16xbf16>
    %134 = vector.shape_cast %133 : vector<1x16x16xbf16> to vector<16x16xbf16>
    %cst_101 = arith.constant dense<0.000000e+00> : vector<16x384xf32>
    %135 = tpu.matmul %134, %96, %cst_101 {dimension_numbers = #tpu.dot_dimension_numbers<[1], [0], [0], [1], [0, 0, 1, 1], [], []>} : vector<16x16xbf16>, vector<16x384xbf16>, vector<16x384xf32> -> vector<16x384xf32>
    %c366_i32_102 = arith.constant 366 : i32
    %136 = tpu.dynamic_rotate %135 by %c366_i32_102 dim 1 : vector<16x384xf32>, i32 -> vector<16x384xf32>
    %137 = arith.addf %132, %136 : vector<16x384xf32>
    %c8_103 = arith.constant 8 : index
    %c0_104 = arith.constant 0 : index
    %c0_105 = arith.constant 0 : index
    %138 = vector.load %arg2[%c8_103, %c0_104, %c0_105] : memref<9x16x16xbf16, #tpu.memory_space<vmem>>, vector<1x16x16xbf16>
    %139 = vector.shape_cast %138 : vector<1x16x16xbf16> to vector<16x16xbf16>
    %cst_106 = arith.constant dense<0.000000e+00> : vector<16x384xf32>
    %140 = tpu.matmul %139, %96, %cst_106 {dimension_numbers = #tpu.dot_dimension_numbers<[1], [0], [0], [1], [0, 0, 1, 1], [], []>} : vector<16x16xbf16>, vector<16x384xbf16>, vector<16x384xf32> -> vector<16x384xf32>
    %c365_i32_107 = arith.constant 365 : i32
    %141 = tpu.dynamic_rotate %140 by %c365_i32_107 dim 1 : vector<16x384xf32>, i32 -> vector<16x384xf32>
    %142 = arith.addf %137, %141 : vector<16x384xf32>
    %143 = vector.broadcast %14 : vector<16x1xf32> to vector<16x384xf32>
    %144 = arith.addf %142, %143 : vector<16x384xf32>
    %145 = arith.negf %144 : vector<16x384xf32>
    %146 = math.exp %145 : vector<16x384xf32>
    %cst_108 = arith.constant 1.000000e+00 : f32
    %147 = vector.broadcast %cst_108 : f32 to vector<16x384xf32>
    %148 = arith.addf %147, %146 : vector<16x384xf32>
    %149 = arith.divf %147, %148 : vector<16x384xf32>
    %cst_109 = arith.constant 0.000000e+00 : f32
    %150 = vector.shape_cast %7 : vector<16x1xi1> to vector<16x1xi1>
    %151 = vector.broadcast %150 : vector<16x1xi1> to vector<16x384xi1>
    %152 = vector.broadcast %cst_109 : f32 to vector<16x384xf32>
    %153 = arith.select %151, %144, %152 : vector<16x384xi1>, vector<16x384xf32>
    %154 = math.exp %153 : vector<16x384xf32>
    %155 = vector.shape_cast %3 : vector<16x1xi1> to vector<16x1xi1>
    %156 = vector.broadcast %155 : vector<16x1xi1> to vector<16x384xi1>
    %157 = arith.select %156, %149, %144 : vector<16x384xi1>, vector<16x384xf32>
    %c0_110 = arith.constant 0 : index
    %c384 = arith.constant 384 : index
    %158 = vector.load %arg7[%c0_110, %c384] : memref<16x768xf32, #tpu.memory_space<vmem>>, vector<16x384xf32>
    tpu.vector_store %arg7[%c0_110, %c384], %157 {strides = array<i32>} : memref<16x768xf32, #tpu.memory_space<vmem>>, vector<16x384xf32>,
    %159 = vector.shape_cast %7 : vector<16x1xi1> to vector<16x1xi1>
    %160 = vector.broadcast %159 : vector<16x1xi1> to vector<16x384xi1>
    %161 = arith.select %160, %154, %149 : vector<16x384xi1>, vector<16x384xf32>
    %162 = vector.broadcast %9 : vector<16x1xf32> to vector<16x384xf32>
    %163 = vector.broadcast %15 : vector<1x384xf32> to vector<16x384xf32>
    %164 = arith.mulf %162, %163 : vector<16x384xf32>
    %165 = arith.addf %161, %164 : vector<16x384xf32>
    %166 = vector.broadcast %11 : vector<16x1xf32> to vector<16x384xf32>
    %167 = vector.broadcast %16 : vector<1x384xf32> to vector<16x384xf32>
    %168 = arith.mulf %166, %167 : vector<16x384xf32>
    %169 = arith.addf %165, %168 : vector<16x384xf32>
    %170 = vector.broadcast %13 : vector<16x1xf32> to vector<16x384xf32>
    %171 = arith.mulf %169, %170 : vector<16x384xf32>
    %c0_111 = arith.constant 0 : index
    %c384_112 = arith.constant 384 : index
    %172 = vector.load %arg8[%c0_111, %c384_112] : memref<16x768xf32, #tpu.memory_space<vmem>>, vector<16x384xf32>
    tpu.vector_store %arg8[%c0_111, %c384_112], %171 {strides = array<i32>} : memref<16x768xf32, #tpu.memory_space<vmem>>, vector<16x384xf32>,
    return
  }
  func.func @transform_0(%arg0: i32) -> (i32, i32, i32) {
    %c0_i32 = arith.constant 0 : i32
    %c0_i32_0 = arith.constant 0 : i32
    %c0_i32_1 = arith.constant 0 : i32
    return %arg0, %c0_i32, %c0_i32_0 : i32, i32, i32
  }
  func.func @transform_1(%arg0: i32) -> (i32, i32, i32) {
    %c0_i32 = arith.constant 0 : i32
    %c0_i32_0 = arith.constant 0 : i32
    %c0_i32_1 = arith.constant 0 : i32
    %c0_i32_2 = arith.constant 0 : i32
    return %c0_i32, %c0_i32_0, %c0_i32_1 : i32, i32, i32
  }
  func.func @transform_2(%arg0: i32) -> (i32, i32) {
    %c0_i32 = arith.constant 0 : i32
    %c0_i32_0 = arith.constant 0 : i32
    %c0_i32_1 = arith.constant 0 : i32
    return %c0_i32, %c0_i32_0 : i32, i32
  }
  func.func @transform_3(%arg0: i32) -> (i32, i32) {
    %c0_i32 = arith.constant 0 : i32
    %c0_i32_0 = arith.constant 0 : i32
    %c0_i32_1 = arith.constant 0 : i32
    return %c0_i32, %c0_i32_0 : i32, i32
  }
  func.func @transform_4(%arg0: i32) -> (i32, i32) {
    %c0_i32 = arith.constant 0 : i32
    %c0_i32_0 = arith.constant 0 : i32
    %c0_i32_1 = arith.constant 0 : i32
    return %c0_i32, %c0_i32_0 : i32, i32
  }
  func.func @transform_5(%arg0: i32) -> (i32, i32, i32) {
    %c0_i32 = arith.constant 0 : i32
    %c0_i32_0 = arith.constant 0 : i32
    %c0_i32_1 = arith.constant 0 : i32
    %c0_i32_2 = arith.constant 0 : i32
    return %c0_i32, %c0_i32_0, %c0_i32_1 : i32, i32, i32
  }
  func.func @transform_6(%arg0: i32) -> (i32, i32) {
    %c0_i32 = arith.constant 0 : i32
    %c0_i32_0 = arith.constant 0 : i32
    return %c0_i32, %arg0 : i32, i32
  }
  func.func @transform_7(%arg0: i32) -> (i32, i32) {
    %c0_i32 = arith.constant 0 : i32
    %c0_i32_0 = arith.constant 0 : i32
    return %c0_i32, %arg0 : i32, i32
  }
}

</mosaic_0001>

<bundles_post_ra>
// kernel: tpu_custom_call.1
= control target key start
LH: loop header
LB: loop body
LE: loop exit
PB: predicated region body
PF: predicated region fallthrough
CT: control target
= control target key end

     0   :  { %13 = vsyncpa [#allocation3], 0  ;;  %s4154_s0 = inlined_call_operand.hbm [shape: bf16[2,16,384], index: 0, kind: input, shape index: {}]   ;;  %s4155_s1 = inlined_call_operand.vmem [shape: bf16[9,16,16], index: 1, kind: input, shape index: {}]   ;;  %s4156_s2 = inlined_call_operand.vmem [shape: f32[16,1], index: 2, kind: input, shape index: {}]   ;;  %s4157_s3 = inlined_call_operand.vmem [shape: f32[1,384], index: 3, kind: input, shape index: {}]   ;;  %s4158_s4 = inlined_call_operand.vmem [shape: f32[1,384], index: 4, kind: input, shape index: {}]   ;;  %s4159_s5 = inlined_call_operand.vmem [shape: f32[5,16,1], index: 5, kind: input, shape index: {}]   ;;  %s4160_s6 = inlined_call_operand.hbm [shape: f32[16,768], index: 6, kind: output, shape index: {0}]   ;;  %s4161_s7 = inlined_call_operand.hbm [shape: f32[16,768], index: 7, kind: output, shape index: {1}]  }
   0x1   :  { %14 = vsyncpa [#allocation4], 0 }
   0x2   :  { %15 = vsyncpa [#allocation7], 0  ;;  %s2999_s24 = smov [#allocation2]   ;;  %s2927_s28 = scalar_lea.hbm %s4154_s0, 768 }
   0x3   :  { %s21_s25 = sshll.u32 %s2999_s24, 4  ;;  %p2928_p0 = scmp.ne.s32.totalorder %s4154_s0, %s2927_s28  ;;  %s22_s25 = int_to_ptr.vmem [resolvable:$true] %s21_s25 }
   0x4   :  { %p2931_p1 = scmp.lt.u32.totalorder %s2927_s28, %s4154_s0 }
   0x6   :  { %p2933_p2 = pnand %p2931_p1, %p2928_p0 }
   0x8   :  { %2936 = shalt.err (!%p2933_p2)
}
   0x9   :  { %s2937_s10 = scalar_lea.vmem %s22_s25, 768  ;;  %p2942_p4 = scmp.lt.s32.totalorder %s22_s25, %s22_s25 }
   0xa   :  { %p2938_p3 = scmp.ne.s32.totalorder %s22_s25, %s2937_s10  ;;  %p2943_p5 = scmp.lt.s32.totalorder %s2937_s10, %s2937_s10 }
   0xc   :  { %p2944_p6 = por %p2943_p5, %p2942_p4 }
   0xe   :  { %p2945_p7 = pnand %p2944_p6, %p2938_p3 }
  0x10   :  { %2948 = shalt.err (!%p2945_p7)
}
  0x11   :  { %s3000_s11 = smov 192   ;;  %s3001_s12 = smov 12  }
  0x12   :  { %27 = dma.hbm_to_vmem [thread:$0]  %s4154_s0, 768, %s22_s25, [#allocation3], %s3000_s11, %s3000_s11, %s3001_s12  }
  0x13   :  { %2993 = dma.done.wait [#allocation3], 768  }
  0x14   :  { %2994 = vsyncadd [#allocation3], 4294966528  ;;  %v3002_v0 = vmov 0.0   ;;  %vm3003_vm0 = vmmov 0   ;;  %v3004_v1 = vmov 0   ;;  %v2833_v5 = vld [vmem:[%s4155_s1] sm:$0xff]  }
  0x15   :  { %2701 = vmatprep.subr.bf16.mxu1 %v3002_v0  ;;  %2703 = vmatprep.mubr.msk.bf16.mxu1 %vm3003_vm0, %v3002_v0  ;;  %v3075_v2 = vld [vmem:[#allocation2 + $0x4] ss:$12 sps:$4 sm:$0xff]   ;;  %v3077_v3 = vld [vmem:[#allocation2 + $0x8] ss:$12 sps:$4 sm:$0xff]   ;;  %v3080_v4 = vld [vmem:[#allocation2] ss:$12 sps:$4 sm:$0xff]  }
  0x16   :  { %127 = vmatprep.mubr.bf16.mxu0 %v3004_v1  ;;  %2828 = vset.pattern.permute.xlu1 %v3004_v1  ;;  %vm91_vm1 = vcmask 130048   ;;  %v2834_v6 = vld [vmem:[%s4155_s1 + $0x8] sm:$0xff]   ;;  %v2835_v7 = vld [vmem:[%s4155_s1 + $0x10] sm:$0xff]   ;;  %v42_v10 = vld [vmem:[%s4159_s5] sm:$0xff]  ;;  %s3005_s18 = smov 19   ;;  %s3007_s19 = smov 17  }
  0x17   :  { %2827 = vset.pattern.permute.xlu0 %v3004_v1  ;;  %95 = vmatprep.subr.bf16.mxu0 %v3075_v2  ;;  %v61_v8 = vld [vmem:[%s4156_s2 + $0x8] sm:$0xff]  ;;  %v2553_v9 = vld [vmem:[%s4159_s5 + $0x10] sm:$0xff]  ;;  %v60_v12 = vld [vmem:[%s4156_s2] sm:$0xff]  ;;  %vm44_vm3 = vcmp.gt.f32.partialorder %v42_v10, 0.5  ;;  %s3008_s20 = smov 1   ;;  %s3009_s21 = smov 127  }
  0x18   :  { %2702 = vmatpush3.bf16.msra.mxu1 %v3077_v3  ;;  %96 = vmatpush1.bf16.msra.mxu0 %v3080_v4  ;;  %vm49_vm2 = vcmp.gt.f32.partialorder %v2553_v9, 0.5  ;;  %v2554_v13 = vld [vmem:[%s4159_s5 + $0x18] sm:$0xff]  ;;  %v1227_v15 = vsel %vm44_vm3, 1, %v3004_v1  ;;  %v43_v16 = vld [vmem:[%s4159_s5 + $0x8] sm:$0xff]  ;;  %v2555_v18 = vld [vmem:[%s4159_s5 + $0x20] sm:$0xff]  ;;  %s3010_s22 = smov 111  }
  0x19   :  { %2707 = vmatprep.subr.bf16.mxu1 %v3002_v0  ;;  %217 = vmatprep.subr.bf16.mxu0 %v3075_v2  ;;  %v1199_v11 = vsel %vm49_vm2, 1, %v3004_v1  ;;  %v2836_v14 = vld [vmem:[%s4155_s1 + $0x18] sm:$0xff]   ;;  %vm50_vm4 = vcmp.gt.f32.partialorder %v2554_v13, 0.5  ;;  %vm45_vm5 = vcmp.gt.f32.partialorder %v43_v16, 0.5  ;;  %v2837_v19 = vld [vmem:[%s4155_s1 + $0x20] sm:$0xff]   ;;  %v2557_v21 = vld [vmem:[%s4159_s5 + $0x30] sm:$0xff] }
  0x1a   :  { %1154 = vperm.xlu1 %2828, %v61_v8   ;;  %1149 = vperm.xlu0 %2827, %v60_v12   ;;  %v1200_v17 = vsel %vm50_vm4, 1, %v3004_v1  ;;  %v1228_v20 = vsel %vm45_vm5, 1, %v3004_v1  ;;  %v2556_v22 = vld [vmem:[%s4159_s5 + $0x28] sm:$0xff]  ;;  %v2839_v24 = vld [vmem:[%s4155_s1 + $0x30] sm:$0xff]   ;;  %v2840_v25 = vld [vmem:[%s4155_s1 + $0x38] sm:$0xff]   ;;  %s3011_s23 = smov 110  }
  0x1b   :  { %2704 = vmatmul.mubr.msk.bf16.vlgmr.msra.gmra.mrb[0].mxu1 %vm91_vm1, %v2833_v5  ;;  %2565 = vmatmul.mubr.msk.bf16.vlgmr.msra.gmra.mrb[0].mxu0 %vm91_vm1, %v2833_v5  ;;  %v2838_v23 = vld [vmem:[%s4155_s1 + $0x28] sm:$0xff]   ;;  %v2841_v27 = vld [vmem:[%s4155_s1 + $0x40] sm:$0xff]   ;;  %v2848_v32 = vld [vmem:[%s4155_s1 + $0x10] sm:$0xff]   ;;  %s3012_s24 = smov 109   ;;  %s3014_s10 = smov [#allocation6]  }
  0x1c   :  { %2708 = vmatpush3.bf16.msra.mxu1 %v3077_v3  ;;  %218 = vmatpush1.bf16.msra.mxu0 %v3080_v4  ;;  %v3205_v26 = vld [vmem:[#allocation2 + $0x1c] ss:$12 sps:$4 sm:$0xff]   ;;  %v3218_v28 = vld [vmem:[#allocation2 + $0x20] ss:$12 sps:$4 sm:$0xff]   ;;  %v3220_v29 = vld [vmem:[#allocation2 + $0x18] ss:$12 sps:$4 sm:$0xff]  }
  0x1d   :  { %2709 = vmatprep.mubr.msk.bf16.mxu1 %vm3003_vm0, %v3002_v0  ;;  %249 = vmatprep.mubr.bf16.mxu0 %v3004_v1  ;;  %v2846_v30 = vld [vmem:[%s4155_s1] sm:$0xff]   ;;  %v2847_v31 = vld [vmem:[%s4155_s1 + $0x8] sm:$0xff]   ;;  %v2849_v33 = vld [vmem:[%s4155_s1 + $0x18] sm:$0xff]   ;;  %s2537_s11 = sshll.u32 %s3014_s10, 4  ;;  %s2538_s11 = int_to_ptr.vmem [resolvable:$true] %s2537_s11 }
  0x1e   :  { %2713 = vmatprep.subr.bf16.mxu1 %v3002_v0  ;;  %337 = vmatprep.subr.bf16.mxu0 %v3075_v2  ;;  %v2850_v34 = vld [vmem:[%s4155_s1 + $0x20] sm:$0xff]   ;;  %v2851_v35 = vld [vmem:[%s4155_s1 + $0x28] sm:$0xff]   ;;  %v2852_v36 = vld [vmem:[%s4155_s1 + $0x30] sm:$0xff]  }
  0x1f   :  { %1202 = vperm.xlu1 %2828, %v1199_v11   ;;  %1205 = vperm.xlu0 %2827, %v1200_v17   ;;  %v2853_v37 = vld [vmem:[%s4155_s1 + $0x38] sm:$0xff]   ;;  %v2854_v38 = vld [vmem:[%s4155_s1 + $0x40] sm:$0xff]   ;;  %s3006_s1 = smov 18  }
  0x23   :  { %2710 = vmatmul.mubr.msk.bf16.vlgmr.msra.gmra.mrb[4].mxu1 %vm91_vm1, %v2834_v6  ;;  %2570 = vmatmul.mubr.msk.bf16.vlgmr.msra.gmra.mrb[4].mxu0 %vm91_vm1, %v2834_v6 }
  0x24   :  { %2714 = vmatpush3.bf16.msra.mxu1 %v3077_v3  ;;  %338 = vmatpush1.bf16.msra.mxu0 %v3080_v4 }
  0x25   :  { %2715 = vmatprep.mubr.msk.bf16.mxu1 %vm3003_vm0, %v3002_v0  ;;  %2719 = vmatprep.subr.bf16.mxu1 %v3002_v0 }
  0x26   :  { %369 = vmatprep.mubr.bf16.mxu0 %v3004_v1  ;;  %457 = vmatprep.subr.bf16.mxu0 %v3075_v2 }
  0x27   :  { %1230 = vperm.xlu1 %2828, %v1227_v15   ;;  %1233 = vperm.xlu0 %2827, %v1228_v20  }
  0x2b   :  { %2716 = vmatmul.mubr.msk.bf16.vlgmr.msra.gmra.mrb[8].mxu1 %vm91_vm1, %v2835_v7  ;;  %2575 = vmatmul.mubr.msk.bf16.vlgmr.msra.gmra.mrb[8].mxu0 %vm91_vm1, %v2835_v7 }
  0x2c   :  { %2720 = vmatpush3.bf16.msra.mxu1 %v3077_v3  ;;  %458 = vmatpush1.bf16.msra.mxu0 %v3080_v4 }
  0x2d   :  { %2721 = vmatprep.mubr.msk.bf16.mxu1 %vm3003_vm0, %v3002_v0  ;;  %2725 = vmatprep.subr.bf16.mxu1 %v3002_v0 }
  0x2e   :  { %489 = vmatprep.mubr.bf16.mxu0 %v3004_v1  ;;  %577 = vmatprep.subr.bf16.mxu0 %v3075_v2 }
  0x2f   :  { %1257 = vperm.xlu1 %2828, %v2555_v18   ;;  %1262 = vperm.xlu0 %2827, %v2556_v22  }
  0x33   :  { %2722 = vmatmul.mubr.msk.bf16.vlgmr.msra.gmra.mrb[12].mxu1 %vm91_vm1, %v2836_v14  ;;  %2580 = vmatmul.mubr.msk.bf16.vlgmr.msra.gmra.mrb[12].mxu0 %vm91_vm1, %v2836_v14 }
  0x34   :  { %2726 = vmatpush3.bf16.msra.mxu1 %v3077_v3  ;;  %578 = vmatpush1.bf16.msra.mxu0 %v3080_v4 }
  0x35   :  { %2727 = vmatprep.mubr.msk.bf16.mxu1 %vm3003_vm0, %v3002_v0  ;;  %2731 = vmatprep.subr.bf16.mxu1 %v3002_v0 }
  0x36   :  { %609 = vmatprep.mubr.bf16.mxu0 %v3004_v1  ;;  %678 = vmatprep.subr.bf16.mxu0 %v3075_v2 }
  0x37   :  { %1295 = vperm.xlu1 %2828, %v2557_v21  }
  0x3b   :  { %2728 = vmatmul.mubr.msk.bf16.vlgmr.msra.gmra.mrb[16].mxu1 %vm91_vm1, %v2837_v19  ;;  %2585 = vmatmul.mubr.msk.bf16.vlgmr.msra.gmra.mrb[16].mxu0 %vm91_vm1, %v2837_v19 }
  0x3c   :  { %2732 = vmatpush3.bf16.msra.mxu1 %v3077_v3  ;;  %679 = vmatpush1.bf16.msra.mxu0 %v3080_v4 }
  0x3d   :  { %2733 = vmatprep.mubr.msk.bf16.mxu1 %vm3003_vm0, %v3002_v0  ;;  %710 = vmatprep.mubr.bf16.mxu0 %v3004_v1 }
  0x3e   :  { %2737 = vmatprep.subr.bf16.mxu1 %v3002_v0  ;;  %798 = vmatprep.subr.bf16.mxu0 %v3075_v2 }
  0x43   :  { %2734 = vmatmul.mubr.msk.bf16.vlgmr.msra.gmra.mrb[20].mxu1 %vm91_vm1, %v2838_v23  ;;  %2590 = vmatmul.mubr.msk.bf16.vlgmr.msra.gmra.mrb[20].mxu0 %vm91_vm1, %v2838_v23 }
  0x44   :  { %2738 = vmatpush3.bf16.msra.mxu1 %v3077_v3  ;;  %799 = vmatpush1.bf16.msra.mxu0 %v3080_v4 }
  0x45   :  { %2739 = vmatprep.mubr.msk.bf16.mxu1 %vm3003_vm0, %v3002_v0  ;;  %830 = vmatprep.mubr.bf16.mxu0 %v3004_v1 }
  0x46   :  { %2743 = vmatprep.subr.bf16.mxu1 %v3002_v0  ;;  %918 = vmatprep.subr.bf16.mxu0 %v3075_v2 }
  0x4b   :  { %2740 = vmatmul.mubr.msk.bf16.vlgmr.msra.gmra.mrb[24].mxu1 %vm91_vm1, %v2839_v24  ;;  %2595 = vmatmul.mubr.msk.bf16.vlgmr.msra.gmra.mrb[24].mxu0 %vm91_vm1, %v2839_v24 }
  0x4c   :  { %2744 = vmatpush3.bf16.msra.mxu1 %v3077_v3  ;;  %919 = vmatpush1.bf16.msra.mxu0 %v3080_v4 }
  0x4d   :  { %2745 = vmatprep.mubr.msk.bf16.mxu1 %vm3003_vm0, %v3002_v0  ;;  %950 = vmatprep.mubr.bf16.mxu0 %v3004_v1 }
  0x4e   :  { %2749 = vmatprep.subr.bf16.mxu1 %v3002_v0  ;;  %1038 = vmatprep.subr.bf16.mxu0 %v3075_v2 }
  0x53   :  { %2746 = vmatmul.mubr.msk.bf16.vlgmr.msra.gmra.mrb[28].mxu1 %vm91_vm1, %v2840_v25  ;;  %2600 = vmatmul.mubr.msk.bf16.vlgmr.msra.gmra.mrb[28].mxu0 %vm91_vm1, %v2840_v25 }
  0x54   :  { %2750 = vmatpush3.bf16.msra.mxu1 %v3077_v3  ;;  %1039 = vmatpush1.bf16.msra.mxu0 %v3080_v4 }
  0x55   :  { %2751 = vmatprep.mubr.msk.bf16.mxu1 %vm3003_vm0, %v3002_v0  ;;  %1070 = vmatprep.mubr.bf16.mxu0 %v3004_v1 }
  0x56   :  { %2755 = vmatprep.subr.bf16.mxu1 %v3002_v0  ;;  %1384 = vmatprep.subr.bf16.mxu0 %v3205_v26 }
  0x5b   :  { %2752 = vmatmul.mubr.msk.bf16.vlgmr.msra.gmra.mrb[32].mxu1 %vm91_vm1, %v2841_v27  ;;  %2605 = vmatmul.mubr.msk.bf16.vlgmr.msra.gmra.mrb[32].mxu0 %vm91_vm1, %v2841_v27 }
  0x5c   :  { %2756 = vmatpush3.bf16.msra.mxu1 %v3218_v28  ;;  %1385 = vmatpush1.bf16.msra.mxu0 %v3220_v29 }
  0x5d   :  { %2757 = vmatprep.mubr.msk.bf16.mxu1 %vm3003_vm0, %v3002_v0  ;;  %1416 = vmatprep.mubr.bf16.mxu0 %v3004_v1 }
  0x5e   :  { %2761 = vmatprep.subr.bf16.mxu1 %v3002_v0  ;;  %1502 = vmatprep.subr.bf16.mxu0 %v3205_v26 }
  0x63   :  { %2758 = vmatmul.mubr.msk.bf16.vlgmr.msra.gmra.mrb[36].mxu1 %vm91_vm1, %v2846_v30  ;;  %2617 = vmatmul.mubr.msk.bf16.vlgmr.msra.gmra.mrb[36].mxu0 %vm91_vm1, %v2846_v30 }
  0x64   :  { %2762 = vmatpush3.bf16.msra.mxu1 %v3218_v28  ;;  %1503 = vmatpush1.bf16.msra.mxu0 %v3220_v29 }
  0x65   :  { %2763 = vmatprep.mubr.msk.bf16.mxu1 %vm3003_vm0, %v3002_v0  ;;  %1534 = vmatprep.mubr.bf16.mxu0 %v3004_v1 }
  0x66   :  { %2767 = vmatprep.subr.bf16.mxu1 %v3002_v0  ;;  %1620 = vmatprep.subr.bf16.mxu0 %v3205_v26 }
  0x6b   :  { %2764 = vmatmul.mubr.msk.bf16.vlgmr.msra.gmra.mrb[40].mxu1 %vm91_vm1, %v2847_v31  ;;  %2622 = vmatmul.mubr.msk.bf16.vlgmr.msra.gmra.mrb[40].mxu0 %vm91_vm1, %v2847_v31 }
  0x6c   :  { %2768 = vmatpush3.bf16.msra.mxu1 %v3218_v28  ;;  %1621 = vmatpush1.bf16.msra.mxu0 %v3220_v29 }
  0x6d   :  { %2769 = vmatprep.mubr.msk.bf16.mxu1 %vm3003_vm0, %v3002_v0  ;;  %2773 = vmatprep.subr.bf16.mxu1 %v3002_v0 }
  0x6e   :  { %1652 = vmatprep.mubr.bf16.mxu0 %v3004_v1  ;;  %1738 = vmatprep.subr.bf16.mxu0 %v3205_v26 }
  0x73   :  { %2770 = vmatmul.mubr.msk.bf16.vlgmr.msra.gmra.mrb[44].mxu1 %vm91_vm1, %v2848_v32  ;;  %2627 = vmatmul.mubr.msk.bf16.vlgmr.msra.gmra.mrb[44].mxu0 %vm91_vm1, %v2848_v32 }
  0x74   :  { %2774 = vmatpush3.bf16.msra.mxu1 %v3218_v28  ;;  %1739 = vmatpush1.bf16.msra.mxu0 %v3220_v29 }
  0x75   :  { %2775 = vmatprep.mubr.msk.bf16.mxu1 %vm3003_vm0, %v3002_v0  ;;  %2779 = vmatprep.subr.bf16.mxu1 %v3002_v0 }
  0x76   :  { %1770 = vmatprep.mubr.bf16.mxu0 %v3004_v1  ;;  %1856 = vmatprep.subr.bf16.mxu0 %v3205_v26 }
  0x7b   :  { %2776 = vmatmul.mubr.msk.bf16.vlgmr.msra.gmra.mrb[48].mxu1 %vm91_vm1, %v2849_v33  ;;  %2632 = vmatmul.mubr.msk.bf16.vlgmr.msra.gmra.mrb[48].mxu0 %vm91_vm1, %v2849_v33 }
  0x7c   :  { %2780 = vmatpush3.bf16.msra.mxu1 %v3218_v28  ;;  %1857 = vmatpush1.bf16.msra.mxu0 %v3220_v29 }
  0x7d   :  { %2781 = vmatprep.mubr.msk.bf16.mxu1 %vm3003_vm0, %v3002_v0  ;;  %2785 = vmatprep.subr.bf16.mxu1 %v3002_v0 }
  0x7e   :  { %1888 = vmatprep.mubr.bf16.mxu0 %v3004_v1  ;;  %1956 = vmatprep.subr.bf16.mxu0 %v3205_v26 }
  0x83   :  { %2782 = vmatmul.mubr.msk.bf16.vlgmr.msra.gmra.mrb[52].mxu1 %vm91_vm1, %v2850_v34  ;;  %2637 = vmatmul.mubr.msk.bf16.vlgmr.msra.gmra.mrb[52].mxu0 %vm91_vm1, %v2850_v34 }
  0x84   :  { %2786 = vmatpush3.bf16.msra.mxu1 %v3218_v28  ;;  %1957 = vmatpush1.bf16.msra.mxu0 %v3220_v29 }
  0x85   :  { %2787 = vmatprep.mubr.msk.bf16.mxu1 %vm3003_vm0, %v3002_v0  ;;  %1988 = vmatprep.mubr.bf16.mxu0 %v3004_v1 }
  0x86   :  { %2791 = vmatprep.subr.bf16.mxu1 %v3002_v0  ;;  %2074 = vmatprep.subr.bf16.mxu0 %v3205_v26 }
  0x8b   :  { %2788 = vmatmul.mubr.msk.bf16.vlgmr.msra.gmra.mrb[56].mxu1 %vm91_vm1, %v2851_v35  ;;  %2642 = vmatmul.mubr.msk.bf16.vlgmr.msra.gmra.mrb[56].mxu0 %vm91_vm1, %v2851_v35 }
  0x8c   :  { %2792 = vmatpush3.bf16.msra.mxu1 %v3218_v28  ;;  %2075 = vmatpush1.bf16.msra.mxu0 %v3220_v29 }
  0x8d   :  { %2793 = vmatprep.mubr.msk.bf16.mxu1 %vm3003_vm0, %v3002_v0  ;;  %2106 = vmatprep.mubr.bf16.mxu0 %v3004_v1 }
  0x8e   :  { %2797 = vmatprep.subr.bf16.mxu1 %v3002_v0  ;;  %2192 = vmatprep.subr.bf16.mxu0 %v3205_v26 }
  0x93   :  { %2794 = vmatmul.mubr.msk.bf16.vlgmr.msra.gmra.mrb[60].mxu1 %vm91_vm1, %v2852_v36  ;;  %2647 = vmatmul.mubr.msk.bf16.vlgmr.msra.gmra.mrb[60].mxu0 %vm91_vm1, %v2852_v36 }
  0x94   :  { %2798 = vmatpush3.bf16.msra.mxu1 %v3218_v28  ;;  %2193 = vmatpush1.bf16.msra.mxu0 %v3220_v29 }
  0x95   :  { %2799 = vmatprep.mubr.msk.bf16.mxu1 %vm3003_vm0, %v3002_v0  ;;  %2224 = vmatprep.mubr.bf16.mxu0 %v3004_v1 }
  0x96   :  { %2310 = vmatprep.subr.bf16.mxu0 %v3205_v26  ;;  %2803 = vmatprep.subr.bf16.mxu1 %v3002_v0 }
  0x9b   :  { %2800 = vmatmul.mubr.msk.bf16.vlgmr.msra.gmra.mrb[64].mxu1 %vm91_vm1, %v2853_v37  ;;  %2652 = vmatmul.mubr.msk.bf16.vlgmr.msra.gmra.mrb[64].mxu0 %vm91_vm1, %v2853_v37 }
  0x9c   :  { %2804 = vmatpush3.bf16.msra.mxu1 %v3218_v28  ;;  %2311 = vmatpush1.bf16.msra.mxu0 %v3220_v29 }
  0x9d   :  { %2342 = vmatprep.mubr.bf16.mxu0 %v3004_v1  ;;  %2805 = vmatprep.mubr.msk.bf16.mxu1 %vm3003_vm0, %v3002_v0 }
  0xa3   :  { %2806 = vmatmul.mubr.msk.bf16.vlgmr.msra.gmra.mrb[68].mxu1 %vm91_vm1, %v2854_v38  ;;  %2657 = vmatmul.mubr.msk.bf16.vlgmr.msra.gmra.mrb[68].mxu0 %vm91_vm1, %v2854_v38 }
  0xee   :  { %v172_v39 = vpop.f32.mrb[0].mxu1  ;;  %v129_v40 = vpop.f32.mrb[0].mxu0 }
  0xef   :  { %v2705_v41 = vpop.f32.mrb[1].mxu1  ;;  %187 = vrot.lane.b32.xlu0 %v172_v39, %s3005_s18  ;;  %v131_v42 = vpop.f32.mrb[1].mxu0 }
  0xf0   :  { %v175_v43 = vpop.f32.mrb[2].mxu1  ;;  %v133_v44 = vpop.f32.mrb[2].mxu0  ;;  %183 = vrot.lane.b32.xlu1 %v131_v42, %s3005_s18 }
  0xf1   :  { %v2706_v45 = vpop.f32.mrb[3].mxu1  ;;  %v135_v46 = vpop.f32.mrb[3].mxu0 }
  0xf3   :  { %179 = vrot.lane.b32.xlu0 %v129_v40, %s3005_s18 }
  0xf4   :  { %189 = vrot.lane.b32.xlu1 %v175_v43, %s3005_s18 }
  0xf6   :  { %v294_v47 = vpop.f32.mrb[4].mxu1  ;;  %v251_v49 = vpop.f32.mrb[4].mxu0 }
  0xf7   :  { %181 = vrot.lane.b32.xlu0 %v133_v44, %s3005_s18  ;;  %v2711_v48 = vpop.f32.mrb[5].mxu1  ;;  %v253_v51 = vpop.f32.mrb[5].mxu0 }
  0xf8   :  { %v297_v50 = vpop.f32.mrb[6].mxu1  ;;  %185 = vrot.lane.b32.xlu1 %v135_v46, %s3005_s18  ;;  %v255_v53 = vpop.f32.mrb[6].mxu0 }
  0xf9   :  { %v2712_v52 = vpop.f32.mrb[7].mxu1  ;;  %v257_v54 = vpop.f32.mrb[7].mxu0 }
  0xfb   :  { %309 = vrot.lane.b32.xlu0 %v294_v47, %s3006_s1 }
  0xfc   :  { %311 = vrot.lane.b32.xlu1 %v297_v50, %s3006_s1 }
  0xfe   :  { %v414_v55 = vpop.f32.mrb[8].mxu1  ;;  %v371_v57 = vpop.f32.mrb[8].mxu0 }
  0xff   :  { %301 = vrot.lane.b32.xlu0 %v251_v49, %s3006_s1  ;;  %v2717_v56 = vpop.f32.mrb[9].mxu1  ;;  %v373_v59 = vpop.f32.mrb[9].mxu0 }
 0x100   :  { %v417_v58 = vpop.f32.mrb[10].mxu1  ;;  %303 = vrot.lane.b32.xlu1 %v255_v53, %s3006_s1  ;;  %v375_v61 = vpop.f32.mrb[10].mxu0 }
 0x101   :  { %v2718_v60 = vpop.f32.mrb[11].mxu1  ;;  %v377_v62 = vpop.f32.mrb[11].mxu0 }
 0x103   :  { %305 = vrot.lane.b32.xlu0 %v253_v51, %s3006_s1 }
 0x104   :  { %307 = vrot.lane.b32.xlu1 %v257_v54, %s3006_s1 }
 0x106   :  { %v534_v63 = vpop.f32.mrb[12].mxu1  ;;  %v491_v1 = vpop.f32.mrb[12].mxu0 }
 0x107   :  { %429 = vrot.lane.b32.xlu0 %v414_v55, %s3007_s19  ;;  %v2723_v0 = vpop.f32.mrb[13].mxu1  ;;  %v493_v3 = vpop.f32.mrb[13].mxu0 }
 0x108   :  { %v537_v2 = vpop.f32.mrb[14].mxu1  ;;  %431 = vrot.lane.b32.xlu1 %v417_v58, %s3007_s19  ;;  %v495_v5 = vpop.f32.mrb[14].mxu0 }
 0x109   :  { %v2724_v4 = vpop.f32.mrb[15].mxu1  ;;  %v497_v6 = vpop.f32.mrb[15].mxu0 }
 0x10a   :  { %v3382_v55 = vpop.permute.xlu1 %1154 }
 0x10b   :  { %421 = vrot.lane.b32.xlu0 %v371_v57, %s3007_s19 }
 0x10c   :  { %423 = vrot.lane.b32.xlu1 %v375_v61, %s3007_s19 }
 0x10e   :  { %v3346_v7 = vpop.f32.mrb[16].mxu1  ;;  %v3349_v9 = vpop.f32.mrb[16].mxu0 }
 0x10f   :  { %425 = vrot.lane.b32.xlu0 %v373_v59, %s3007_s19  ;;  %v2729_v8 = vpop.f32.mrb[17].mxu1  ;;  %v3353_v11 = vpop.f32.mrb[17].mxu0 }
 0x110   :  { %v3351_v10 = vpop.f32.mrb[18].mxu1  ;;  %427 = vrot.lane.b32.xlu1 %v377_v62, %s3007_s19  ;;  %v3356_v13 = vpop.f32.mrb[18].mxu0 }
 0x111   :  { %v2730_v12 = vpop.f32.mrb[19].mxu1  ;;  %v3358_v14 = vpop.f32.mrb[19].mxu0 }
 0x112   :  { %v3391_v0 = vpop.permute.xlu1 %1202 }
 0x113   :  { %549 = vrot.lane.b32.xlu0 %v534_v63, %s3008_s20  ;;  %vm1207_vm14 = vcmp.eq.s32.totalorder %v3391_v0, 1 }
 0x114   :  { %551 = vrot.lane.b32.xlu1 %v537_v2, %s3008_s20 }
 0x116   :  { %v755_v15 = vpop.f32.mrb[20].mxu1  ;;  %v712_v17 = vpop.f32.mrb[20].mxu0 }
 0x117   :  { %541 = vrot.lane.b32.xlu0 %v491_v1, %s3008_s20  ;;  %v2735_v16 = vpop.f32.mrb[21].mxu1  ;;  %v714_v19 = vpop.f32.mrb[21].mxu0 }
 0x118   :  { %v758_v18 = vpop.f32.mrb[22].mxu1  ;;  %543 = vrot.lane.b32.xlu1 %v495_v5, %s3008_s20  ;;  %v716_v21 = vpop.f32.mrb[22].mxu0 }
 0x119   :  { %v2736_v20 = vpop.f32.mrb[23].mxu1  ;;  %v718_v22 = vpop.f32.mrb[23].mxu0 }
 0x11a   :  { %v3394_v1 = vpop.permute.xlu0 %1149  ;;  %v3409_v16 = vpop.permute.xlu1 %1230 }
 0x11b   :  { %545 = vrot.lane.b32.xlu0 %v493_v3, %s3008_s20  ;;  %vm1235_vm0 = vcmp.eq.s32.totalorder %v3409_v16, 1 }
 0x11c   :  { %547 = vrot.lane.b32.xlu1 %v497_v6, %s3008_s20 }
 0x11e   :  { %v875_v23 = vpop.f32.mrb[24].mxu1  ;;  %v832_v25 = vpop.f32.mrb[24].mxu0 }
 0x11f   :  { %770 = vrot.lane.b32.xlu0 %v755_v15, %s3009_s21  ;;  %v2741_v24 = vpop.f32.mrb[25].mxu1  ;;  %v834_v27 = vpop.f32.mrb[25].mxu0 }
 0x120   :  { %v878_v26 = vpop.f32.mrb[26].mxu1  ;;  %772 = vrot.lane.b32.xlu1 %v758_v18, %s3009_s21  ;;  %v836_v29 = vpop.f32.mrb[26].mxu0 }
 0x121   :  { %v2742_v28 = vpop.f32.mrb[27].mxu1  ;;  %v838_v30 = vpop.f32.mrb[27].mxu0 }
 0x123   :  { %762 = vrot.lane.b32.xlu0 %v712_v17, %s3009_s21  ;;  %v3412_v17 = vpop.permute.xlu0 %1205 }
 0x124   :  { %764 = vrot.lane.b32.xlu1 %v716_v21, %s3009_s21  ;;  %vm1208_vm15 = vcmp.eq.s32.totalorder %v3412_v17, 1 }
 0x126   :  { %v995_v31 = vpop.f32.mrb[28].mxu1  ;;  %v952_v33 = vpop.f32.mrb[28].mxu0 }
 0x127   :  { %766 = vrot.lane.b32.xlu0 %v714_v19, %s3009_s21  ;;  %v2747_v32 = vpop.f32.mrb[29].mxu1  ;;  %v954_v35 = vpop.f32.mrb[29].mxu0 }
 0x128   :  { %v998_v34 = vpop.f32.mrb[30].mxu1  ;;  %768 = vrot.lane.b32.xlu1 %v718_v22, %s3009_s21  ;;  %v956_v37 = vpop.f32.mrb[30].mxu0 }
 0x129   :  { %v2748_v36 = vpop.f32.mrb[31].mxu1  ;;  %v958_v38 = vpop.f32.mrb[31].mxu0 }
 0x12b   :  { %890 = vrot.lane.b32.xlu0 %v875_v23, %s3010_s22 }
 0x12c   :  { %892 = vrot.lane.b32.xlu1 %v878_v26, %s3010_s22  ;;  %v3429_v26 = vpop.permute.xlu1 %1257 }
 0x12e   :  { %v1115_v39 = vpop.f32.mrb[32].mxu1  ;;  %v1072_v41 = vpop.f32.mrb[32].mxu0 }
 0x12f   :  { %882 = vrot.lane.b32.xlu0 %v832_v25, %s3010_s22  ;;  %v2753_v40 = vpop.f32.mrb[33].mxu1  ;;  %v1074_v43 = vpop.f32.mrb[33].mxu0 }
 0x130   :  { %v1118_v42 = vpop.f32.mrb[34].mxu1  ;;  %884 = vrot.lane.b32.xlu1 %v836_v29, %s3010_s22  ;;  %v1076_v45 = vpop.f32.mrb[34].mxu0 }
 0x131   :  { %v2754_v44 = vpop.f32.mrb[35].mxu1  ;;  %v1078_v46 = vpop.f32.mrb[35].mxu0 }
 0x133   :  { %886 = vrot.lane.b32.xlu0 %v834_v27, %s3010_s22  ;;  %v3432_v27 = vpop.permute.xlu0 %1233 }
 0x134   :  { %888 = vrot.lane.b32.xlu1 %v838_v30, %s3010_s22  ;;  %vm1236_vm1 = vcmp.eq.s32.totalorder %v3432_v27, 1 }
 0x136   :  { %v1461_v47 = vpop.f32.mrb[36].mxu1  ;;  %v1418_v49 = vpop.f32.mrb[36].mxu0 }
 0x137   :  { %1010 = vrot.lane.b32.xlu0 %v995_v31, %s3011_s23  ;;  %v2759_v48 = vpop.f32.mrb[37].mxu1  ;;  %v1420_v51 = vpop.f32.mrb[37].mxu0 }
 0x138   :  { %v1464_v50 = vpop.f32.mrb[38].mxu1  ;;  %1012 = vrot.lane.b32.xlu1 %v998_v34, %s3011_s23  ;;  %v1422_v53 = vpop.f32.mrb[38].mxu0 }
 0x139   :  { %v2760_v52 = vpop.f32.mrb[39].mxu1  ;;  %v1424_v54 = vpop.f32.mrb[39].mxu0 }
 0x13a   :  { %v3449_v36 = vpop.permute.xlu0 %1262 }
 0x13b   :  { %1002 = vrot.lane.b32.xlu0 %v952_v33, %s3011_s23 }
 0x13c   :  { %1004 = vrot.lane.b32.xlu1 %v956_v37, %s3011_s23  ;;  %v3452_v37 = vpop.permute.xlu1 %1295 }
 0x13e   :  { %v1579_v56 = vpop.f32.mrb[40].mxu1  ;;  %v1536_v58 = vpop.f32.mrb[40].mxu0 }
 0x13f   :  { %1006 = vrot.lane.b32.xlu0 %v954_v35, %s3011_s23  ;;  %v2765_v57 = vpop.f32.mrb[41].mxu1  ;;  %v3385_v60 = vpop.f32.mrb[41].mxu0 }
 0x140   :  { %v1582_v59 = vpop.f32.mrb[42].mxu1  ;;  %1008 = vrot.lane.b32.xlu1 %v958_v38, %s3011_s23  ;;  %v1540_v62 = vpop.f32.mrb[42].mxu0 }
 0x141   :  { %v2766_v61 = vpop.f32.mrb[43].mxu1  ;;  %v3388_v63 = vpop.f32.mrb[43].mxu0 }
 0x143   :  { %1130 = vrot.lane.b32.xlu0 %v1115_v39, %s3012_s24  ;;  %v4162_v39 = vlaneseq }
 0x144   :  { %1132 = vrot.lane.b32.xlu1 %v1118_v42, %s3012_s24 }
 0x145   :  { %v3464_v44 = vand.u32 127, %v4162_v39 }
 0x146   :  { %v1697_v2 = vpop.f32.mrb[44].mxu1  ;;  %v3397_v4 = vpop.f32.mrb[44].mxu0 }
 0x147   :  { %1122 = vrot.lane.b32.xlu0 %v1072_v41, %s3012_s24  ;;  %v2771_v3 = vpop.f32.mrb[45].mxu1  ;;  %v3401_v6 = vpop.f32.mrb[45].mxu0  ;;  %vm193_vm6 = vcmp.lt.s32.totalorder %v3464_v44, 19  ;;  %vm313_vm7 = vcmp.lt.s32.totalorder %v3464_v44, 18  ;;  %vm433_vm8 = vcmp.lt.s32.totalorder %v3464_v44, 17  ;;  %vm553_vm9 = vcmp.lt.s32.totalorder %v3464_v44, 1 }
 0x148   :  { %v3399_v5 = vpop.f32.mrb[46].mxu1  ;;  %1124 = vrot.lane.b32.xlu1 %v1076_v45, %s3012_s24  ;;  %v3404_v12 = vpop.f32.mrb[46].mxu0  ;;  %vm774_vm10 = vcmp.lt.s32.totalorder %v3464_v44, 127  ;;  %vm894_vm11 = vcmp.lt.s32.totalorder %v3464_v44, 111  ;;  %vm1014_vm12 = vcmp.lt.s32.totalorder %v3464_v44, 110  ;;  %vm1134_vm13 = vcmp.lt.s32.totalorder %v3464_v44, 109 }
 0x149   :  { %v2772_v8 = vpop.f32.mrb[47].mxu1  ;;  %v3406_v15 = vpop.f32.mrb[47].mxu0 }
 0x14b   :  { %1126 = vrot.lane.b32.xlu0 %v1074_v43, %s3012_s24 }
 0x14c   :  { %1128 = vrot.lane.b32.xlu1 %v1078_v46, %s3012_s24 }
 0x14e   :  { %v3414_v18 = vpop.f32.mrb[48].mxu1  ;;  %v3417_v20 = vpop.f32.mrb[48].mxu0 }
 0x14f   :  { %1476 = vrot.lane.b32.xlu0 %v1461_v47, %s3005_s18  ;;  %v2777_v19 = vpop.f32.mrb[49].mxu1  ;;  %v3421_v22 = vpop.f32.mrb[49].mxu0 }
 0x150   :  { %v3419_v21 = vpop.f32.mrb[50].mxu1  ;;  %1478 = vrot.lane.b32.xlu1 %v1464_v50, %s3005_s18  ;;  %v3424_v24 = vpop.f32.mrb[50].mxu0 }
 0x151   :  { %v2778_v23 = vpop.f32.mrb[51].mxu1  ;;  %v3426_v25 = vpop.f32.mrb[51].mxu0 }
 0x153   :  { %1468 = vrot.lane.b32.xlu0 %v1418_v49, %s3005_s18 }
 0x154   :  { %1470 = vrot.lane.b32.xlu1 %v1422_v53, %s3005_s18 }
 0x156   :  { %v3434_v28 = vpop.f32.mrb[52].mxu1  ;;  %v3437_v30 = vpop.f32.mrb[52].mxu0 }
 0x157   :  { %4164 = vst [vmem:[#allocation11_spill] sm:$0xff] %v3434_v28  ;;  %1472 = vrot.lane.b32.xlu0 %v1420_v51, %s3005_s18  ;;  %v2783_v29 = vpop.f32.mrb[53].mxu1  ;;  %4165 = vst [vmem:[#allocation12_spill] sm:$0xff] %v3437_v30  ;;  %v3441_v32 = vpop.f32.mrb[53].mxu0 }
 0x158   :  { %v3439_v31 = vpop.f32.mrb[54].mxu1  ;;  %4167 = vst [vmem:[#allocation14_spill] sm:$0xff] %v3441_v32  ;;  %1474 = vrot.lane.b32.xlu1 %v1424_v54, %s3005_s18  ;;  %v3444_v34 = vpop.f32.mrb[54].mxu0 }
 0x159   :  { %4166 = vst [vmem:[#allocation13_spill] sm:$0xff] %v3439_v31  ;;  %v2784_v33 = vpop.f32.mrb[55].mxu1  ;;  %4168 = vst [vmem:[#allocation15_spill] sm:$0xff] %v3444_v34  ;;  %v3446_v35 = vpop.f32.mrb[55].mxu0 }
 0x15a   :  { %4169 = vst [vmem:[#allocation16_spill] sm:$0xff] %v3446_v35 }
 0x15b   :  { %1594 = vrot.lane.b32.xlu0 %v1579_v56, %s3006_s1 }
 0x15c   :  { %1596 = vrot.lane.b32.xlu1 %v1582_v59, %s3006_s1 }
 0x15e   :  { %v3454_v38 = vpop.f32.mrb[56].mxu1  ;;  %v3457_v41 = vpop.f32.mrb[56].mxu0 }
 0x15f   :  { %1586 = vrot.lane.b32.xlu0 %v1536_v58, %s3006_s1  ;;  %v2789_v40 = vpop.f32.mrb[57].mxu1  ;;  %v3461_v43 = vpop.f32.mrb[57].mxu0 }
 0x160   :  { %v3459_v42 = vpop.f32.mrb[58].mxu1  ;;  %1588 = vrot.lane.b32.xlu1 %v1540_v62, %s3006_s1  ;;  %v3469_v47 = vpop.f32.mrb[58].mxu0 }
 0x161   :  { %v3466_v45 = vpop.permute.xlu0 %187  ;;  %v2790_v46 = vpop.f32.mrb[59].mxu1 }
 0x162   :  { %v3473_v48 = vpop.permute.xlu1 %183  ;;  %v3475_v49 = vpop.f32.mrb[59].mxu0 }
 0x163   :  { %1590 = vrot.lane.b32.xlu0 %v3385_v60, %s3006_s1 }
 0x164   :  { %1592 = vrot.lane.b32.xlu1 %v3388_v63, %s3006_s1 }
 0x165   :  { %v180_v50 = vpop.permute.xlu0 %179 }
 0x166   :  { %v3483_v51 = vsel %vm193_vm6, %v180_v50, %v3473_v48  ;;  %v3485_v52 = vpop.f32.mrb[60].mxu1  ;;  %v190_v53 = vpop.permute.xlu1 %189 }
 0x167   :  { %1712 = vrot.lane.b32.xlu0 %v1697_v2, %s3007_s19  ;;  %v2795_v54 = vpop.f32.mrb[61].mxu1  ;;  %v3490_v57 = vpop.f32.mrb[60].mxu0 }
 0x168   :  { %v3488_v56 = vpop.f32.mrb[62].mxu1  ;;  %1714 = vrot.lane.b32.xlu1 %v3399_v5, %s3007_s19  ;;  %v3496_v61 = vpop.f32.mrb[61].mxu0 }
 0x169   :  { %v182_v58 = vpop.permute.xlu0 %181  ;;  %v2796_v59 = vpop.f32.mrb[63].mxu1 }
 0x16a   :  { %v199_v60 = vsel %vm193_vm6, %v190_v53, %v182_v58  ;;  %v186_v62 = vpop.permute.xlu1 %185  ;;  %v3500_v63 = vpop.f32.mrb[62].mxu0 }
 0x16b   :  { %1704 = vrot.lane.b32.xlu0 %v3397_v4, %s3007_s19  ;;  %v3504_v2 = vsel %vm193_vm6, %v186_v62, %v190_v53  ;;  %v197_v3 = vsel %vm193_vm6, %v182_v58, %v186_v62  ;;  %v3508_v5 = vpop.f32.mrb[63].mxu0 }
 0x16c   :  { %1706 = vrot.lane.b32.xlu1 %v3404_v12, %s3007_s19  ;;  %v198_v12 = vsel %vm193_vm6, %v3466_v45, %v180_v50 }
 0x16d   :  { %v310_v8 = vpop.permute.xlu0 %309 }
 0x16e   :  { %v3512_v19 = vpop.f32.mrb[64].mxu1  ;;  %v312_v4 = vpop.permute.xlu1 %311 }
 0x16f   :  { %1708 = vrot.lane.b32.xlu0 %v3401_v6, %s3007_s19  ;;  %v2801_v23 = vpop.f32.mrb[65].mxu1  ;;  %v3519_v33 = vpop.f32.mrb[64].mxu0 }
 0x170   :  { %v3517_v29 = vpop.f32.mrb[66].mxu1  ;;  %1710 = vrot.lane.b32.xlu1 %v3406_v15, %s3007_s19  ;;  %v3528_v53 = vpop.f32.mrb[65].mxu0 }
 0x171   :  { %v302_v40 = vpop.permute.xlu0 %301  ;;  %v2802_v46 = vpop.f32.mrb[67].mxu1 }
 0x172   :  { %v318_v6 = vsel %vm313_vm7, %v310_v8, %v302_v40  ;;  %v304_v58 = vpop.permute.xlu1 %303  ;;  %v3532_v59 = vpop.f32.mrb[66].mxu0 }
 0x173   :  { %v320_v54 = vadd.f32 %v318_v6, %v198_v12  ;;  %1830 = vrot.lane.b32.xlu0 %v3414_v18, %s3008_s20  ;;  %v319_v15 = vsel %vm313_vm7, %v312_v4, %v304_v58  ;;  %v3536_v62 = vpop.f32.mrb[67].mxu0 }
 0x174   :  { %v323_v23 = vadd.f32 %v319_v15, %v199_v60  ;;  %1832 = vrot.lane.b32.xlu1 %v3419_v21, %s3008_s20 }
 0x175   :  { %v306_v46 = vpop.permute.xlu0 %305 }
 0x176   :  { %v3540_v50 = vpop.f32.mrb[68].mxu1  ;;  %v308_v12 = vpop.permute.xlu1 %307 }
 0x177   :  { %1822 = vrot.lane.b32.xlu0 %v3417_v20, %s3008_s20  ;;  %v3544_v18 = vpop.f32.mrb[68].mxu0  ;;  %v317_v6 = vsel %vm313_vm7, %v304_v58, %v308_v12  ;;  %v2807_v35 = vpop.f32.mrb[69].mxu1 }
 0x178   :  { %v3548_v39 = vpop.f32.mrb[69].mxu0  ;;  %v324_v31 = vadd.f32 %v317_v6, %v197_v3  ;;  %1824 = vrot.lane.b32.xlu1 %v3424_v24, %s3008_s20  ;;  %v3556_v32 = vpop.f32.mrb[70].mxu1 }
 0x179   :  { %v430_v60 = vpop.permute.xlu0 %429  ;;  %v3552_v21 = vpop.f32.mrb[70].mxu0 }
 0x17a   :  { %v3554_v15 = vpop.f32.mrb[71].mxu0  ;;  %v432_v20 = vpop.permute.xlu1 %431 }
 0x17b   :  { %1826 = vrot.lane.b32.xlu0 %v3421_v22, %s3008_s20  ;;  %v2808_v28 = vpop.f32.mrb[71].mxu1 }
 0x17c   :  { %1828 = vrot.lane.b32.xlu1 %v3426_v25, %s3008_s20  ;;  %v316_v28 = vsel %vm313_vm7, %v302_v40, %v306_v46  ;;  %v315_v40 = vsel %vm313_vm7, %v308_v12, %v312_v4 }
 0x17d   :  { %v422_v58 = vpop.permute.xlu0 %421 }
 0x17e   :  { %v424_v35 = vpop.permute.xlu1 %423  ;;  %v438_v25 = vsel %vm433_vm8, %v430_v60, %v422_v58 }
 0x17f   :  { %2048 = vrot.lane.b32.xlu0 %v3454_v38, %s3009_s21  ;;  %v440_v6 = vadd.f32 %v438_v25, %v320_v54 }
 0x180   :  { %2050 = vrot.lane.b32.xlu1 %v3459_v42, %s3009_s21  ;;  %v439_v42 = vsel %vm433_vm8, %v432_v20, %v424_v35 }
 0x181   :  { %v426_v24 = vpop.permute.xlu0 %425 }
 0x182   :  { %v428_v22 = vpop.permute.xlu1 %427 }
 0x183   :  { %2040 = vrot.lane.b32.xlu0 %v3457_v41, %s3009_s21  ;;  %v314_v41 = vsel %vm313_vm7, %v306_v46, %v310_v8  ;;  %v434_v8 = vsel %vm433_vm8, %v426_v24, %v430_v60  ;;  %v436_v46 = vsel %vm433_vm8, %v422_v58, %v426_v24  ;;  %v437_v4 = vsel %vm433_vm8, %v424_v35, %v428_v22 }
 0x184   :  { %2042 = vrot.lane.b32.xlu1 %v3469_v47, %s3009_s21  ;;  %v194_v47 = vsel %vm193_vm6, %v3473_v48, %v3466_v45  ;;  %v443_v48 = vadd.f32 %v439_v42, %v323_v23  ;;  %v435_v12 = vsel %vm433_vm8, %v428_v22, %v432_v20 }
 0x185   :  { %v550_v3 = vpop.permute.xlu0 %549  ;;  %v322_v45 = vadd.f32 %v314_v41, %v194_v47 }
 0x186   :  { %v552_v38 = vpop.permute.xlu1 %551 }
 0x187   :  { %2044 = vrot.lane.b32.xlu0 %v3461_v43, %s3009_s21  ;;  %v321_v43 = vadd.f32 %v316_v28, %v3483_v51  ;;  %v325_v51 = vadd.f32 %v315_v40, %v3504_v2  ;;  %v442_v24 = vadd.f32 %v434_v8, %v322_v45 }
 0x188   :  { %2046 = vrot.lane.b32.xlu1 %v3475_v49, %s3009_s21 }
 0x189   :  { %v542_v34 = vpop.permute.xlu0 %541  ;;  %v441_v58 = vadd.f32 %v436_v46, %v321_v43  ;;  %v445_v35 = vadd.f32 %v435_v12, %v325_v51 }
 0x18a   :  { %v558_v30 = vsel %vm553_vm9, %v550_v3, %v542_v34  ;;  %v544_v49 = vpop.permute.xlu1 %543 }
 0x18b   :  { %v560_v54 = vadd.f32 %v558_v30, %v440_v6  ;;  %2166 = vrot.lane.b32.xlu0 %v3485_v52, %s3010_s22  ;;  %v559_v60 = vsel %vm553_vm9, %v552_v38, %v544_v49  ;;  %v444_v52 = vadd.f32 %v437_v4, %v324_v31 }
 0x18c   :  { %v563_v25 = vadd.f32 %v559_v60, %v443_v48  ;;  %2168 = vrot.lane.b32.xlu1 %v3488_v56, %s3010_s22 }
 0x18d   :  { %v546_v23 = vpop.permute.xlu0 %545  ;;  %v3609_v30 = vadd.f32 %v3349_v9, %v560_v54 }
 0x18e   :  { %v554_v2 = vsel %vm553_vm9, %v546_v23, %v550_v3  ;;  %v556_v20 = vsel %vm553_vm9, %v542_v34, %v546_v23  ;;  %v548_v41 = vpop.permute.xlu1 %547  ;;  %v3618_v42 = vadd.f32 %v3356_v13, %v563_v25 }
 0x18f   :  { %v561_v22 = vadd.f32 %v556_v20, %v441_v58  ;;  %v562_v28 = vadd.f32 %v554_v2, %v442_v24  ;;  %2158 = vrot.lane.b32.xlu0 %v3490_v57, %s3010_s22  ;;  %v555_v9 = vsel %vm553_vm9, %v548_v41, %v552_v38  ;;  %v557_v31 = vsel %vm553_vm9, %v544_v49, %v548_v41 }
 0x190   :  { %v564_v56 = vadd.f32 %v557_v31, %v444_v52  ;;  %v565_v3 = vadd.f32 %v555_v9, %v445_v35  ;;  %2160 = vrot.lane.b32.xlu1 %v3500_v63, %s3010_s22 }
 0x191   :  { %v771_v47 = vpop.permute.xlu0 %770  ;;  %v663_v34 = vadd.f32 %v3346_v7, %v562_v28  ;;  %v662_v57 = vadd.f32 %v3353_v11, %v561_v22 }
 0x192   :  { %v773_v13 = vpop.permute.xlu1 %772  ;;  %v666_v40 = vadd.f32 %v3351_v10, %v565_v3  ;;  %v3632_v38 = vadd.f32 %v3358_v14, %v564_v56 }
 0x193   :  { %2162 = vrot.lane.b32.xlu0 %v3496_v61, %s3010_s22 }
 0x194   :  { %2164 = vrot.lane.b32.xlu1 %v3508_v5, %s3010_s22 }
 0x195   :  { %v763_v6 = vpop.permute.xlu0 %762 }
 0x196   :  { %v765_v63 = vpop.permute.xlu1 %764 }
 0x197   :  { %2284 = vrot.lane.b32.xlu0 %v3512_v19, %s3011_s23  ;;  %v780_v43 = vsel %vm774_vm10, %v773_v13, %v765_v63 }
 0x198   :  { %2286 = vrot.lane.b32.xlu1 %v3517_v29, %s3011_s23  ;;  %v786_v51 = vadd.f32 %v780_v43, %v666_v40 }
 0x199   :  { %v767_v7 = vpop.permute.xlu0 %766 }
 0x19a   :  { %v769_v11 = vpop.permute.xlu1 %768  ;;  %v775_v45 = vsel %vm774_vm10, %v767_v7, %v771_v47  ;;  %v777_v48 = vsel %vm774_vm10, %v763_v6, %v767_v7 }
 0x19b   :  { %2276 = vrot.lane.b32.xlu0 %v3519_v33, %s3011_s23  ;;  %v776_v12 = vsel %vm774_vm10, %v769_v11, %v773_v13  ;;  %v778_v60 = vsel %vm774_vm10, %v765_v63, %v769_v11  ;;  %v781_v25 = vadd.f32 %v777_v48, %v3609_v30  ;;  %v782_v23 = vadd.f32 %v775_v45, %v662_v57 }
 0x19c   :  { %2278 = vrot.lane.b32.xlu1 %v3532_v59, %s3011_s23  ;;  %v2558_v59 = vld [vmem:[%s4159_s5 + $0x38] sm:$0xff]  ;;  %v784_v9 = vadd.f32 %v778_v60, %v3618_v42  ;;  %v785_v30 = vadd.f32 %v776_v12, %v3632_v38 }
 0x19d   :  { %v891_v10 = vpop.permute.xlu0 %890 }
 0x19e   :  { %v893_v14 = vpop.permute.xlu1 %892 }
 0x19f   :  { %2280 = vrot.lane.b32.xlu0 %v3528_v53, %s3011_s23 }
 0x1a0   :  { %2282 = vrot.lane.b32.xlu1 %v3536_v62, %s3011_s23 }
 0x1a1   :  { %v883_v61 = vpop.permute.xlu0 %882 }
 0x1a2   :  { %v885_v5 = vpop.permute.xlu1 %884  ;;  %v899_v8 = vsel %vm894_vm11, %v891_v10, %v883_v61 }
 0x1a3   :  { %2394 = vrot.lane.b32.xlu0 %v3544_v18, %s3012_s24  ;;  %v900_v54 = vsel %vm894_vm11, %v893_v14, %v885_v5 }
 0x1a4   :  { %2396 = vrot.lane.b32.xlu1 %v3552_v21, %s3012_s24  ;;  %v906_v20 = vadd.f32 %v900_v54, %v786_v51 }
 0x1a5   :  { %v887_v19 = vpop.permute.xlu0 %886 }
 0x1a6   :  { %v889_v29 = vpop.permute.xlu1 %888  ;;  %v897_v52 = vsel %vm894_vm11, %v883_v61, %v887_v19  ;;  %v895_v35 = vsel %vm894_vm11, %v887_v19, %v891_v10 }
 0x1a7   :  { %2398 = vrot.lane.b32.xlu0 %v3548_v39, %s3012_s24  ;;  %v2559_v39 = vld [vmem:[%s4159_s5 + $0x40] sm:$0xff]  ;;  %v898_v22 = vsel %vm894_vm11, %v885_v5, %v889_v29  ;;  %v901_v3 = vadd.f32 %v897_v52, %v781_v25  ;;  %v902_v40 = vadd.f32 %v895_v35, %v782_v23 }
 0x1a8   :  { %2400 = vrot.lane.b32.xlu1 %v3554_v15, %s3012_s24  ;;  %v779_v15 = vsel %vm774_vm10, %v771_v47, %v763_v6  ;;  %v896_v6 = vsel %vm894_vm11, %v889_v29, %v893_v14  ;;  %v904_v42 = vadd.f32 %v898_v22, %v784_v9 }
 0x1a9   :  { %v1011_v33 = vpop.permute.xlu0 %1010  ;;  %v783_v46 = vadd.f32 %v779_v15, %v663_v34 }
 0x1aa   :  { %v1013_v53 = vpop.permute.xlu1 %1012 }
 0x1ab   :  { %2402 = vrot.lane.b32.xlu0 %v3540_v50, %s3012_s24  ;;  %v2560_v50 = vld [vmem:[%s4159_s5 + $0x48] sm:$0xff]  ;;  %v903_v58 = vadd.f32 %v899_v8, %v783_v46 }
 0x1ac   :  { %2404 = vrot.lane.b32.xlu1 %v3556_v32, %s3012_s24 }
 0x1ad   :  { %v1003_v62 = vpop.permute.xlu0 %1002 }
 0x1ae   :  { %v1005_v18 = vpop.permute.xlu1 %1004  ;;  %v1019_v49 = vsel %vm1014_vm12, %v1011_v33, %v1003_v62 }
 0x1af   :  { %1300 = vperm.xlu0 %2827, %v2558_v59   ;;  %v1020_v2 = vsel %vm1014_vm12, %v1013_v53, %v1005_v18  ;;  %v1023_v28 = vadd.f32 %v1019_v49, %v903_v58 }
 0x1b0   :  { %1333 = vperm.xlu1 %2828, %v2559_v39   ;;  %v1026_v47 = vadd.f32 %v1020_v2, %v906_v20 }
 0x1b1   :  { %v1007_v21 = vpop.permute.xlu0 %1006 }
 0x1b2   :  { %v1009_v32 = vpop.permute.xlu1 %1008  ;;  %v1017_v31 = vsel %vm1014_vm12, %v1003_v62, %v1007_v21  ;;  %v1015_v34 = vsel %vm1014_vm12, %v1007_v21, %v1011_v33  ;;  %v905_v33 = vadd.f32 %v896_v6, %v785_v30 }
 0x1b3   :  { %1338 = vperm.xlu0 %2827, %v2560_v50   ;;  %v1021_v63 = vadd.f32 %v1017_v31, %v901_v3  ;;  %v1018_v7 = vsel %vm1014_vm12, %v1005_v18, %v1009_v32  ;;  %v1022_v5 = vadd.f32 %v1015_v34, %v902_v40  ;;  %v1016_v19 = vsel %vm1014_vm12, %v1009_v32, %v1013_v53 }
 0x1b4   :  { %v1024_v50 = vadd.f32 %v1018_v7, %v904_v42  ;;  %v1025_v32 = vadd.f32 %v1016_v19, %v905_v33 }
 0x1b5   :  { %v1131_v4 = vpop.permute.xlu0 %1130 }
 0x1b6   :  { %v1133_v24 = vpop.permute.xlu1 %1132 }
 0x1b9   :  { %v1123_v41 = vpop.permute.xlu0 %1122 }
 0x1ba   :  { %v1139_v56 = vsel %vm1134_vm13, %v1131_v4, %v1123_v41  ;;  %v1125_v13 = vpop.permute.xlu1 %1124 }
 0x1bb   :  { %v1143_v57 = vadd.f32 %v1139_v56, %v1023_v28  ;;  %v1140_v38 = vsel %vm1134_vm13, %v1133_v24, %v1125_v13 }
 0x1bc   :  { %v1146_v10 = vadd.f32 %v1140_v38, %v1026_v47  ;;  %v4170_v47 = vlaneseq }
 0x1bd   :  { %v3715_v11 = vadd.f32 %v3394_v1, %v1143_v57  ;;  %v1127_v61 = vpop.permute.xlu0 %1126 }
 0x1be   :  { %v1135_v14 = vsel %vm1134_vm13, %v1127_v61, %v1131_v4  ;;  %v1137_v29 = vsel %vm1134_vm13, %v1123_v41, %v1127_v61  ;;  %v3725_v62 = vadd.f32 %v3382_v55, %v1146_v10  ;;  %v1129_v18 = vpop.permute.xlu1 %1128  ;;  %v3777_v34 = vshrl.u32 %v4170_v47, 7 }
 0x1bf   :  { %v2609_v59 = vmul.f32 -1.442695, %v3715_v11  ;;  %v1141_v39 = vadd.f32 %v1137_v29, %v1021_v63  ;;  %v1142_v21 = vadd.f32 %v1135_v14, %v1022_v5  ;;  %v1136_v15 = vsel %vm1134_vm13, %v1129_v18, %v1133_v24 }
 0x1c0   :  { %v1138_v53 = vsel %vm1134_vm13, %v1125_v13, %v1129_v18  ;;  %v2612_v43 = vmul.f32 -1.442695, %v3725_v62  ;;  %v1145_v54 = vadd.f32 %v1136_v15, %v1025_v32  ;;  %v1211_v12 = vsel %vm1207_vm14, %v3715_v11, 0.0  ;;  %v62_v18 = vld [vmem:[%s4157_s3] sm:$0x7]  ;;  %s3013_s3 = smov [#allocation5]  }
 0x1c1   :  { %2855 = vpow2.f32 %v2609_v59  ;;  %v3733_v8 = vadd.f32 %v3394_v1, %v1141_v39  ;;  %v1477_v46 = vpop.permute.xlu0 %1476  ;;  %v3736_v45 = vadd.f32 %v3394_v1, %v1142_v21  ;;  %v1144_v48 = vadd.f32 %v1138_v53, %v1024_v50 }
 0x1c2   :  { %2857 = vpow2.f32 %v2612_v43  ;;  %v1479_v49 = vpop.permute.xlu1 %1478  ;;  %v3749_v58 = vadd.f32 %v3382_v55, %v1145_v54  ;;  %v1214_v25 = vsel %vm1208_vm15, %v3725_v62, 0.0  ;;  %v1219_v35 = vmul.f32 1.442695, %v1211_v12 }
 0x1c3   :  { %v2607_v4 = vmul.f32 -1.442695, %v3733_v8  ;;  %v2608_v51 = vmul.f32 -1.442695, %v3736_v45  ;;  %v3746_v60 = vadd.f32 %v3382_v55, %v1144_v48  ;;  %v1209_v22 = vsel %vm1207_vm14, %v3733_v8, 0.0 }
 0x1c4   :  { %v2611_v2 = vmul.f32 -1.442695, %v3749_v58  ;;  %v1225_v41 = vmul.f32 1.442695, %v1214_v25  ;;  %v1210_v30 = vsel %vm1207_vm14, %v3736_v45, 0.0  ;;  %v1213_v5 = vsel %vm1208_vm15, %v3749_v58, 0.0 }
 0x1c5   :  { %2859 = vpow2.f32 %v2607_v4  ;;  %v1469_v24 = vpop.permute.xlu0 %1468  ;;  %v2610_v52 = vmul.f32 -1.442695, %v3746_v60  ;;  %v1215_v57 = vmul.f32 1.442695, %v1209_v22  ;;  %v1217_v63 = vmul.f32 1.442695, %v1210_v30 }
 0x1c6   :  { %2861 = vpow2.f32 %v2608_v51  ;;  %v3756_v23 = vsel %vm193_vm6, %v1477_v46, %v1469_v24  ;;  %v1471_v20 = vpop.permute.xlu1 %1470  ;;  %v1212_v7 = vsel %vm1208_vm15, %v3746_v60, 0.0  ;;  %v1276_v33 = vsub.s32 2, %v3777_v34  ;;  %v63_v48 = vld [vmem:[%s4158_s4] sm:$0x7]  ;;  %s2525_s4 = sshll.u32 %s3013_s3, 4  ;;  %s4110_s4 = int_to_ptr.vmem [resolvable:$true] %s2525_s4 }
 0x1c7   :  { %v3765_v28 = vsel %vm193_vm6, %v1479_v49, %v1471_v20  ;;  %2863 = vpow2.f32 %v2610_v52  ;;  %v1221_v39 = vmul.f32 1.442695, %v1212_v7  ;;  %v1223_v21 = vmul.f32 1.442695, %v1213_v5  ;;  %s2949_s12 = scalar_lea.vmem %s4110_s4, 1536  ;;  %p2954_p9 = scmp.lt.s32.totalorder %s4110_s4, %s4110_s4 }
 0x1c8   :  { %2865 = vpow2.f32 %v2611_v2  ;;  %v1268_v32 = vsub.s32 0, %v3777_v34  ;;  %v1272_v43 = vsub.s32 1, %v3777_v34  ;;  %v1277_v54 = vrot.slane %v62_v18, %v1276_v33  ;;  %p2950_p8 = scmp.ne.s32.totalorder %s4110_s4, %s2949_s12  ;;  %p2955_p10 = scmp.lt.s32.totalorder %s2949_s12, %s2949_s12 }
 0x1c9   :  { %v1473_v9 = vpop.permute.xlu0 %1472  ;;  %2867 = vpow2.f32 %v1219_v35  ;;  %v3813_v52 = vrot.slane %v63_v48, %v1276_v33 }
 0x1ca   :  { %v1480_v31 = vsel %vm193_vm6, %v1473_v9, %v1477_v46  ;;  %v3774_v56 = vsel %vm193_vm6, %v1469_v24, %v1473_v9  ;;  %v1475_v13 = vpop.permute.xlu1 %1474  ;;  %2869 = vpow2.f32 %v1225_v41  ;;  %v1273_v35 = vrot.slane %v62_v18, %v1272_v43  ;;  %p2956_p11 = por %p2955_p10, %p2954_p9 }
 0x1cb   :  { %v2856_v3 = vpop.eup %2855  ;;  %v1481_v6 = vsel %vm193_vm6, %v1475_v13, %v1479_v49  ;;  %v1483_v42 = vsel %vm193_vm6, %v1471_v20, %v1475_v13  ;;  %v1269_v20 = vrot.slane %v62_v18, %v1268_v32  ;;  %v3818_v30 = vmul.f32 %v1277_v54, %v3429_v26 }
 0x1cc   :  { %v1183_v40 = vadd.f32 1.0, %v2856_v3  ;;  %v2858_v38 = vpop.eup %2857  ;;  %v3837_v7 = vmul.f32 %v1277_v54, %v3449_v36  ;;  %p2957_p12 = pnand %p2956_p11, %p2950_p8 }
 0x1cd   :  { %v3786_v10 = vpop.permute.xlu0 %1594  ;;  %v1186_v61 = vadd.f32 1.0, %v2858_v38 }
 0x1ce   :  { %2871 = vrcp.f32 %v1183_v40  ;;  %v3791_v14 = vpop.permute.xlu1 %1596  ;;  %4171 = vst [vmem:[#allocation17_spill] sm:$0xff] %v3837_v7 }
 0x1cf   :  { %v2860_v19 = vpop.eup %2859  ;;  %2873 = vpow2.f32 %v1215_v57 }
 0x1d0   :  { %v2862_v29 = vpop.eup %2861  ;;  %2875 = vrcp.f32 %v1186_v61  ;;  %v1181_v59 = vadd.f32 1.0, %v2860_v19  ;;  %v3839_v61 = vrot.slane %v63_v48, %v1268_v32 }
 0x1d1   :  { %v1182_v50 = vadd.f32 1.0, %v2862_v29  ;;  %2877 = vpow2.f32 %v1217_v63  ;;  %v3797_v15 = vpop.permute.xlu0 %1586  ;;  %v2864_v53 = vpop.eup %2863  ;;  %v3849_v29 = vrot.slane %v63_v48, %v1272_v43 }
 0x1d2   :  { %2879 = vrcp.f32 %v1181_v59  ;;  %v3801_v46 = vpop.permute.xlu1 %1588  ;;  %v2866_v4 = vpop.eup %2865  ;;  %v1184_v49 = vadd.f32 1.0, %v2864_v53 }
 0x1d3   :  { %2881 = vrcp.f32 %v1182_v50  ;;  %v1185_v51 = vadd.f32 1.0, %v2866_v4  ;;  %v2868_v24 = vpop.eup %2867 }
 0x1d4   :  { %2883 = vpow2.f32 %v1221_v39  ;;  %v2870_v2 = vpop.eup %2869  ;;  %v3854_v39 = vmul.f32 %v1269_v20, %v3429_v26 }
 0x1d5   :  { %2885 = vpow2.f32 %v1223_v21  ;;  %v3806_v12 = vpop.permute.xlu0 %1590 }
 0x1d6   :  { %2887 = vrcp.f32 %v1184_v49  ;;  %v1598_v25 = vsel %vm313_vm7, %v3806_v12, %v3786_v10  ;;  %v1593_v41 = vpop.permute.xlu1 %1592  ;;  %v3878_v49 = vmul.f32 %v3839_v61, %v3452_v37 }
 0x1d7   :  { %2889 = vrcp.f32 %v1185_v51  ;;  %v3815_v22 = vadd.f32 %v1598_v25, %v1480_v31  ;;  %v1599_v3 = vsel %vm313_vm7, %v1593_v41, %v3791_v14  ;;  %v1601_v47 = vsel %vm313_vm7, %v3801_v46, %v1593_v41 }
 0x1d8   :  { %v2872_v9 = vpop.eup %2871  ;;  %v3830_v57 = vadd.f32 %v1601_v47, %v1483_v42  ;;  %v3832_v13 = vadd.f32 %v1599_v3, %v1481_v6  ;;  %v3883_v25 = vmul.f32 %v3849_v29, %v3452_v37  ;;  %v3892_v3 = vmul.f32 %v1273_v35, %v3449_v36 }
 0x1d9   :  { %v2874_v34 = vpop.eup %2873  ;;  %v1239_v31 = vsel %vm1235_vm0, %v2872_v9, %v3715_v11  ;;  %v1713_v40 = vpop.permute.xlu0 %1712  ;;  %v1251_v38 = vsel %vm1207_vm14, %v2868_v24, %v2872_v9  ;;  %v3844_v11 = vmul.f32 %v3813_v52, %v3452_v37 }
 0x1da   :  { %v2876_v63 = vpop.eup %2875  ;;  %1245 = vst [vmem:[#allocation5 + $0x10] sm:$0xff] %v1239_v31  ;;  %v1289_v5 = vadd.f32 %v3818_v30, %v1251_v38  ;;  %v1715_v19 = vpop.permute.xlu1 %1714 }
 0x1db   :  { %v2878_v42 = vpop.eup %2877  ;;  %v1242_v6 = vsel %vm1236_vm1, %v2876_v63, %v3725_v62  ;;  %v1254_v33 = vsel %vm1208_vm15, %v2870_v2, %v2876_v63  ;;  %v3863_v62 = vmul.f32 %v1273_v35, %v3429_v26  ;;  %v3886_v2 = vmul.f32 %v1269_v20, %v3449_v36 }
 0x1dc   :  { %v2880_v59 = vpop.eup %2879  ;;  %1248 = vst [vmem:[#allocation5 + $0x40] sm:$0xff] %v1242_v6  ;;  %v3857_v18 = vadd.f32 %v3837_v7, %v1254_v33  ;;  %v3860_v50 = vadd.f32 %v3844_v11, %v1289_v5  ;;  %v1602_v63 = vsel %vm313_vm7, %v3786_v10, %v3797_v15 }
 0x1dd   :  { %v2882_v21 = vpop.eup %2881  ;;  %v1237_v53 = vsel %vm1235_vm0, %v2880_v59, %v3733_v8  ;;  %v1705_v32 = vpop.permute.xlu0 %1704  ;;  %v1249_v43 = vsel %vm1207_vm14, %v2874_v34, %v2880_v59  ;;  %v1604_v6 = vadd.f32 %v1602_v63, %v3756_v23  ;;  %v1600_v59 = vsel %vm313_vm7, %v3797_v15, %v3806_v12 }
 0x1de   :  { %v2884_v48 = vpop.eup %2883  ;;  %v1238_v4 = vsel %vm1235_vm0, %v2882_v21, %v3736_v45  ;;  %1243 = vst [vmem:[#allocation5] sm:$0xff] %v1237_v53  ;;  %v1250_v54 = vsel %vm1207_vm14, %v2878_v42, %v2882_v21  ;;  %v1287_v26 = vadd.f32 %v3854_v39, %v1249_v43  ;;  %v1707_v51 = vpop.permute.xlu1 %1706  ;;  %v1720_v42 = vsel %vm433_vm8, %v1713_v40, %v1705_v32 }
 0x1df   :  { %v2886_v8 = vpop.eup %2885  ;;  %1244 = vst [vmem:[#allocation5 + $0x8] sm:$0xff] %v1238_v4  ;;  %v1288_v24 = vadd.f32 %v3863_v62, %v1250_v54  ;;  %v1721_v10 = vsel %vm433_vm8, %v1715_v19, %v1707_v51  ;;  %v1722_v53 = vadd.f32 %v1720_v42, %v1604_v6 }
 0x1e0   :  { %v2888_v45 = vpop.eup %2887  ;;  %v3889_v41 = vadd.f32 %v3878_v49, %v1287_v26 }
 0x1e1   :  { %v2890_v9 = vpop.eup %2889  ;;  %v1240_v47 = vsel %vm1236_vm1, %v2888_v45, %v3746_v60  ;;  %v1709_v34 = vpop.permute.xlu0 %1708  ;;  %v1252_v37 = vsel %vm1208_vm15, %v2884_v48, %v2888_v45  ;;  %v3900_v31 = vadd.f32 %v3883_v25, %v1288_v24  ;;  %v1605_v48 = vadd.f32 %v1600_v59, %v3774_v56  ;;  %v4172_v45 = vld [vmem:[#allocation12_spill] sm:$0xff]  ;;  %v4175_v59 = vld [vmem:[#allocation14_spill] sm:$0xff] }
 0x1e2   :  { %v1241_v20 = vsel %vm1236_vm1, %v2890_v9, %v3749_v58  ;;  %1246 = vst [vmem:[#allocation5 + $0x30] sm:$0xff] %v1240_v47  ;;  %v1253_v36 = vsel %vm1208_vm15, %v2886_v8, %v2890_v9  ;;  %v1711_v35 = vpop.permute.xlu1 %1710  ;;  %v3908_v38 = vadd.f32 %v3886_v2, %v1252_v37  ;;  %v1603_v58 = vsel %vm313_vm7, %v3791_v14, %v3801_v46 }
 0x1e3   :  { %1247 = vst [vmem:[#allocation5 + $0x38] sm:$0xff] %v1241_v20  ;;  %v3911_v60 = vadd.f32 %v3892_v3, %v1253_v36  ;;  %v1607_v21 = vadd.f32 %v1603_v58, %v3765_v28  ;;  %v1716_v14 = vsel %vm433_vm8, %v1709_v34, %v1713_v40  ;;  %v1718_v46 = vsel %vm433_vm8, %v1705_v32, %v1709_v34  ;;  %v4173_v36 = vld [vmem:[#allocation15_spill] sm:$0xff] }
 0x1e4   :  { %v1719_v15 = vsel %vm433_vm8, %v1707_v51, %v1711_v35  ;;  %v1717_v28 = vsel %vm433_vm8, %v1711_v35, %v1715_v19  ;;  %v1723_v26 = vadd.f32 %v1718_v46, %v1605_v48  ;;  %v1724_v32 = vadd.f32 %v1716_v14, %v3815_v22 }
 0x1e5   :  { %v1831_v5 = vpop.permute.xlu0 %1830  ;;  %v1725_v4 = vadd.f32 %v1721_v10, %v1607_v21  ;;  %v1726_v56 = vadd.f32 %v1719_v15, %v3830_v57  ;;  %v1727_v19 = vadd.f32 %v1717_v28, %v3832_v13  ;;  %v4176_v13 = vld [vmem:[#allocation13_spill] sm:$0xff] }
 0x1e6   :  { %v1833_v33 = vpop.permute.xlu1 %1832 }
 0x1e9   :  { %v1823_v43 = vpop.permute.xlu0 %1822 }
 0x1ea   :  { %v1838_v23 = vsel %vm553_vm9, %v1831_v5, %v1823_v43  ;;  %v1825_v54 = vpop.permute.xlu1 %1824 }
 0x1eb   :  { %v1840_v12 = vadd.f32 %v1838_v23, %v1722_v53  ;;  %v1839_v40 = vsel %vm553_vm9, %v1833_v33, %v1825_v54 }
 0x1ec   :  { %v1843_v8 = vadd.f32 %v1839_v40, %v1725_v4 }
 0x1ed   :  { %v1827_v24 = vpop.permute.xlu0 %1826  ;;  %v1940_v9 = vadd.f32 %v4172_v45, %v1840_v12 }
 0x1ee   :  { %v1834_v51 = vsel %vm553_vm9, %v1827_v24, %v1831_v5  ;;  %v1836_v47 = vsel %vm553_vm9, %v1823_v43, %v1827_v24  ;;  %v1829_v20 = vpop.permute.xlu1 %1828  ;;  %v1943_v35 = vadd.f32 %v4173_v36, %v1843_v8  ;;  %v4174_v5 = vld [vmem:[#allocation11_spill] sm:$0xff]  ;;  %v4177_v43 = vld [vmem:[#allocation16_spill] sm:$0xff] }
 0x1ef   :  { %v1841_v34 = vadd.f32 %v1836_v47, %v1723_v26  ;;  %v1842_v37 = vadd.f32 %v1834_v51, %v1724_v32  ;;  %v1835_v22 = vsel %vm553_vm9, %v1829_v20, %v1833_v33  ;;  %v1837_v63 = vsel %vm553_vm9, %v1825_v54, %v1829_v20 }
 0x1f0   :  { %v1844_v57 = vadd.f32 %v1837_v63, %v1726_v56  ;;  %v1845_v58 = vadd.f32 %v1835_v22, %v1727_v19 }
 0x1f1   :  { %v2049_v42 = vpop.permute.xlu0 %2048  ;;  %v1942_v6 = vadd.f32 %v4174_v5, %v1842_v37  ;;  %v1941_v10 = vadd.f32 %v4175_v59, %v1841_v34 }
 0x1f2   :  { %v2051_v21 = vpop.permute.xlu1 %2050  ;;  %v1945_v53 = vadd.f32 %v4176_v13, %v1845_v58  ;;  %v1944_v14 = vadd.f32 %v4177_v43, %v1844_v57 }
 0x1f5   :  { %v2041_v46 = vpop.permute.xlu0 %2040 }
 0x1f6   :  { %v2043_v23 = vpop.permute.xlu1 %2042  ;;  %v2056_v34 = vsel %vm774_vm10, %v2049_v42, %v2041_v46 }
 0x1f7   :  { %v2057_v57 = vsel %vm774_vm10, %v2051_v21, %v2043_v23  ;;  %v2060_v43 = vadd.f32 %v2056_v34, %v1942_v6 }
 0x1f9   :  { %v2045_v48 = vpop.permute.xlu0 %2044 }
 0x1fa   :  { %v2047_v4 = vpop.permute.xlu1 %2046  ;;  %v2054_v56 = vsel %vm774_vm10, %v2041_v46, %v2045_v48  ;;  %v2052_v37 = vsel %vm774_vm10, %v2045_v48, %v2049_v42 }
 0x1fb   :  { %v2055_v47 = vsel %vm774_vm10, %v2043_v23, %v2047_v4  ;;  %v2058_v20 = vadd.f32 %v2054_v56, %v1940_v9  ;;  %v2053_v58 = vsel %vm774_vm10, %v2047_v4, %v2051_v21  ;;  %v2059_v46 = vadd.f32 %v2052_v37, %v1941_v10 }
 0x1fc   :  { %v2061_v5 = vadd.f32 %v2055_v47, %v1943_v35  ;;  %v2063_v35 = vadd.f32 %v2057_v57, %v1945_v53  ;;  %v2062_v4 = vadd.f32 %v2053_v58, %v1944_v14 }
 0x1fd   :  { %v2167_v33 = vpop.permute.xlu0 %2166 }
 0x1fe   :  { %v2169_v15 = vpop.permute.xlu1 %2168 }
 0x201   :  { %v2159_v12 = vpop.permute.xlu0 %2158 }
 0x202   :  { %v2161_v54 = vpop.permute.xlu1 %2160  ;;  %v2174_v48 = vsel %vm894_vm11, %v2167_v33, %v2159_v12 }
 0x203   :  { %v2178_v34 = vadd.f32 %v2174_v48, %v2060_v43 }
 0x205   :  { %v2163_v28 = vpop.permute.xlu0 %2162 }
 0x206   :  { %v2165_v40 = vpop.permute.xlu1 %2164  ;;  %v2172_v19 = vsel %vm894_vm11, %v2159_v12, %v2163_v28  ;;  %v2170_v9 = vsel %vm894_vm11, %v2163_v28, %v2167_v33 }
 0x207   :  { %v2173_v22 = vsel %vm894_vm11, %v2161_v54, %v2165_v40  ;;  %v2176_v59 = vadd.f32 %v2172_v19, %v2058_v20  ;;  %v2171_v23 = vsel %vm894_vm11, %v2165_v40, %v2169_v15  ;;  %v2177_v28 = vadd.f32 %v2170_v9, %v2059_v46 }
 0x208   :  { %v2179_v56 = vadd.f32 %v2173_v22, %v2061_v5  ;;  %v2175_v40 = vsel %vm894_vm11, %v2169_v15, %v2161_v54  ;;  %v2180_v37 = vadd.f32 %v2171_v23, %v2062_v4 }
 0x209   :  { %v2285_v26 = vpop.permute.xlu0 %2284 }
 0x20a   :  { %v2287_v32 = vpop.permute.xlu1 %2286 }
 0x20d   :  { %v2277_v8 = vpop.permute.xlu0 %2276 }
 0x20e   :  { %v2279_v24 = vpop.permute.xlu1 %2278  ;;  %v2292_v47 = vsel %vm1014_vm12, %v2285_v26, %v2277_v8 }
 0x211   :  { %v2281_v45 = vpop.permute.xlu0 %2280 }
 0x212   :  { %v2283_v51 = vpop.permute.xlu1 %2282  ;;  %v2290_v63 = vsel %vm1014_vm12, %v2277_v8, %v2281_v45  ;;  %v2288_v6 = vsel %vm1014_vm12, %v2281_v45, %v2285_v26  ;;  %v2296_v8 = vadd.f32 %v2292_v47, %v2178_v34 }
 0x213   :  { %v2291_v42 = vsel %vm1014_vm12, %v2279_v24, %v2283_v51  ;;  %v2294_v7 = vadd.f32 %v2290_v63, %v2176_v59  ;;  %v2295_v14 = vadd.f32 %v2288_v6, %v2177_v28  ;;  %v2289_v45 = vsel %vm1014_vm12, %v2283_v51, %v2287_v32 }
 0x214   :  { %v2297_v19 = vadd.f32 %v2291_v42, %v2179_v56  ;;  %v2181_v63 = vadd.f32 %v2175_v40, %v2063_v35  ;;  %v2298_v59 = vadd.f32 %v2289_v45, %v2180_v37 }
 0x215   :  { %v2395_v36 = vpop.permute.xlu0 %2394 }
 0x216   :  { %v2397_v13 = vpop.permute.xlu1 %2396 }
 0x219   :  { %v2399_v21 = vpop.permute.xlu0 %2398 }
 0x21a   :  { %v2408_v10 = vsel %vm1134_vm13, %v2395_v36, %v2399_v21  ;;  %v2401_v12 = vpop.permute.xlu1 %2400 }
 0x21b   :  { %v2412_v33 = vadd.f32 %v2408_v10, %v2294_v7  ;;  %v2409_v53 = vsel %vm1134_vm13, %v2397_v13, %v2401_v12  ;;  %v2293_v7 = vsel %vm1014_vm12, %v2287_v32, %v2279_v24 }
 0x21c   :  { %v2415_v22 = vadd.f32 %v2409_v53, %v2297_v19  ;;  %v2299_v24 = vadd.f32 %v2293_v7, %v2181_v63 }
 0x21d   :  { %v4000_v20 = vadd.f32 %v2412_v33, %v3394_v1  ;;  %v2403_v26 = vpop.permute.xlu0 %2402 }
 0x21e   :  { %v2406_v15 = vsel %vm1134_vm13, %v2399_v21, %v2403_v26  ;;  %v2410_v54 = vsel %vm1134_vm13, %v2403_v26, %v2395_v36  ;;  %v4010_v51 = vadd.f32 %v2415_v22, %v3382_v55  ;;  %v2405_v5 = vpop.permute.xlu1 %2404 }
 0x21f   :  { %v2659_v57 = vmul.f32 -1.442695, %v4000_v20  ;;  %v2413_v58 = vadd.f32 %v2406_v15, %v2295_v14  ;;  %v2414_v43 = vadd.f32 %v2410_v54, %v2296_v8  ;;  %v2407_v46 = vsel %vm1134_vm13, %v2401_v12, %v2405_v5 }
 0x220   :  { %v2411_v32 = vsel %vm1134_vm13, %v2405_v5, %v2397_v13  ;;  %v2662_v36 = vmul.f32 -1.442695, %v4010_v51  ;;  %v2416_v48 = vadd.f32 %v2407_v46, %v2298_v59  ;;  %v2460_v44 = vsel %vm1207_vm14, %v4000_v20, 0.0 }
 0x221   :  { %2891 = vpow2.f32 %v2659_v57  ;;  %v4018_v9 = vadd.f32 %v2413_v58, %v3394_v1  ;;  %v4021_v42 = vadd.f32 %v2414_v43, %v3394_v1  ;;  %v2417_v56 = vadd.f32 %v2411_v32, %v2299_v24 }
 0x222   :  { %2893 = vpow2.f32 %v2662_v36  ;;  %v2463_v21 = vsel %vm1208_vm15, %v4010_v51, 0.0  ;;  %v4032_v35 = vadd.f32 %v2416_v48, %v3382_v55  ;;  %v2466_v6 = vmul.f32 1.442695, %v2460_v44 }
 0x223   :  { %v2660_v23 = vmul.f32 -1.442695, %v4018_v9  ;;  %v2661_v13 = vmul.f32 -1.442695, %v4021_v42  ;;  %v4035_v1 = vadd.f32 %v2417_v56, %v3382_v55  ;;  %v2461_v4 = vsel %vm1207_vm14, %v4018_v9, 0.0 }
 0x224   :  { %v2663_v10 = vmul.f32 -1.442695, %v4032_v35  ;;  %v2472_v47 = vmul.f32 1.442695, %v2463_v21  ;;  %v2462_v19 = vsel %vm1207_vm14, %v4021_v42, 0.0  ;;  %v2464_v37 = vsel %vm1208_vm15, %v4032_v35, 0.0 }
 0x225   :  { %2895 = vpow2.f32 %v2660_v23  ;;  %v2664_v28 = vmul.f32 -1.442695, %v4035_v1  ;;  %v2468_v33 = vmul.f32 1.442695, %v2461_v4  ;;  %v2470_v12 = vmul.f32 1.442695, %v2462_v19 }
 0x226   :  { %2897 = vpow2.f32 %v2661_v13  ;;  %v2465_v53 = vsel %vm1208_vm15, %v4035_v1, 0.0  ;;  %v2474_v63 = vmul.f32 1.442695, %v2464_v37 }
 0x227   :  { %2899 = vpow2.f32 %v2663_v10  ;;  %v2476_v57 = vmul.f32 1.442695, %v2465_v53 }
 0x228   :  { %2901 = vpow2.f32 %v2664_v28 }
 0x229   :  { %2903 = vpow2.f32 %v2466_v6 }
 0x22a   :  { %2905 = vpow2.f32 %v2472_v47 }
 0x22b   :  { %v2892_v55 = vpop.eup %2891  ;;  %2907 = vpow2.f32 %v2468_v33 }
 0x22c   :  { %v2442_v34 = vadd.f32 1.0, %v2892_v55  ;;  %v2894_v40 = vpop.eup %2893 }
 0x22d   :  { %v2445_v14 = vadd.f32 1.0, %v2894_v40 }
 0x22e   :  { %2909 = vrcp.f32 %v2442_v34  ;;  %v1301_v45 = vpop.permute.xlu0 %1300 }
 0x22f   :  { %v2896_v22 = vpop.eup %2895  ;;  %2911 = vpow2.f32 %v2470_v12  ;;  %v1322_v26 = vmul.f32 %v3839_v61, %v1301_v45  ;;  %v4053_v8 = vmul.f32 %v3849_v29, %v1301_v45  ;;  %v4056_v7 = vmul.f32 %v3813_v52, %v1301_v45  ;;  %v4058_v58 = vpop.permute.xlu1 %1333 }
 0x230   :  { %v2898_v15 = vpop.eup %2897  ;;  %2913 = vrcp.f32 %v2445_v14  ;;  %v2443_v54 = vadd.f32 1.0, %v2896_v22  ;;  %v1341_v52 = vmul.f32 %v4058_v58, %v3889_v41  ;;  %v1342_v29 = vmul.f32 %v4058_v58, %v3900_v31 }
 0x231   :  { %v2444_v5 = vadd.f32 1.0, %v2898_v15  ;;  %v1328_v59 = vadd.f32 %v1322_v26, %v3908_v38  ;;  %v1329_v43 = vadd.f32 %v4053_v8, %v3911_v60  ;;  %v1330_v61 = vadd.f32 %v4056_v7, %v3857_v18  ;;  %v2900_v24 = vpop.eup %2899 }
 0x232   :  { %2915 = vrcp.f32 %v2443_v54  ;;  %v1343_v46 = vmul.f32 %v4058_v58, %v3860_v50  ;;  %v4071_v32 = vpop.permute.xlu0 %1338  ;;  %v2902_v36 = vpop.eup %2901  ;;  %v2446_v48 = vadd.f32 1.0, %v2900_v24  ;;  %1347 = vst [vmem:[#allocation6] sm:$0xff] %v1341_v52  ;;  %1348 = vst [vmem:[#allocation6 + $0x8] sm:$0xff] %v1342_v29 }
 0x233   :  { %2917 = vrcp.f32 %v2444_v5  ;;  %v1344_v38 = vmul.f32 %v4071_v32, %v1328_v59  ;;  %v1345_v60 = vmul.f32 %v4071_v32, %v1329_v43  ;;  %v1346_v18 = vmul.f32 %v4071_v32, %v1330_v61  ;;  %v2904_v41 = vpop.eup %2903 }
 0x234   :  { %2919 = vpow2.f32 %v2474_v63  ;;  %1349 = vst [vmem:[#allocation6 + $0x10] sm:$0xff] %v1343_v46  ;;  %v2447_v31 = vadd.f32 1.0, %v2902_v36  ;;  %v2906_v50 = vpop.eup %2905 }
 0x235   :  { %2921 = vpow2.f32 %v2476_v57  ;;  %1350 = vst [vmem:[#allocation6 + $0x30] sm:$0xff] %v1344_v38  ;;  %1351 = vst [vmem:[#allocation6 + $0x38] sm:$0xff] %v1345_v60  ;;  %v2908_v23 = vpop.eup %2907 }
 0x236   :  { %1352 = vst [vmem:[#allocation6 + $0x40] sm:$0xff] %v1346_v18  ;;  %2923 = vrcp.f32 %v2446_v48 }
 0x237   :  { %2925 = vrcp.f32 %v2447_v31 }
 0x238   :  { %v2910_v56 = vpop.eup %2909 }
 0x239   :  { %v2912_v44 = vpop.eup %2911  ;;  %v2478_v13 = vsel %vm1235_vm0, %v2910_v56, %v4000_v20  ;;  %v2490_v21 = vsel %vm1207_vm14, %v2904_v41, %v2910_v56 }
 0x23a   :  { %v2914_v4 = vpop.eup %2913  ;;  %2484 = vst [vmem:[#allocation5 + $0x18] sm:$0xff] %v2478_v13  ;;  %v2496_v6 = vadd.f32 %v2490_v21, %v3854_v39 }
 0x23b   :  { %v2481_v10 = vsel %vm1236_vm1, %v2914_v4, %v4010_v51  ;;  %v2493_v28 = vsel %vm1208_vm15, %v2906_v50, %v2914_v4 }
 0x23c   :  { %v2916_v47 = vpop.eup %2915  ;;  %2487 = vst [vmem:[#allocation5 + $0x48] sm:$0xff] %v2481_v10  ;;  %v2499_v19 = vadd.f32 %v2493_v28, %v3886_v2  ;;  %v2502_v20 = vadd.f32 %v2496_v6, %v3878_v49 }
 0x23d   :  { %v2918_v33 = vpop.eup %2917  ;;  %v2479_v55 = vsel %vm1235_vm0, %v2916_v47, %v4018_v9  ;;  %v2491_v39 = vsel %vm1207_vm14, %v2908_v23, %v2916_v47 }
 0x23e   :  { %v2920_v12 = vpop.eup %2919  ;;  %v2480_v51 = vsel %vm1235_vm0, %v2918_v33, %v4021_v42  ;;  %2485 = vst [vmem:[#allocation5 + $0x20] sm:$0xff] %v2479_v55  ;;  %v2492_v34 = vsel %vm1207_vm14, %v2912_v44, %v2918_v33  ;;  %v2497_v2 = vadd.f32 %v2491_v39, %v3863_v62  ;;  %v2505_v49 = vadd.f32 %v2499_v19, %v1322_v26 }
 0x23f   :  { %v2922_v40 = vpop.eup %2921  ;;  %2486 = vst [vmem:[#allocation5 + $0x28] sm:$0xff] %v2480_v51  ;;  %v2498_v9 = vadd.f32 %v2492_v34, %v3818_v30  ;;  %v2508_v37 = vmul.f32 %v2502_v20, %v4058_v58 }
 0x240   :  { %v2924_v53 = vpop.eup %2923  ;;  %v2503_v14 = vadd.f32 %v2497_v2, %v3883_v25  ;;  %v2511_v16 = vmul.f32 %v2505_v49, %v4071_v32 }
 0x241   :  { %v2926_v42 = vpop.eup %2925  ;;  %v2482_v0 = vsel %vm1236_vm1, %v2924_v53, %v4032_v35  ;;  %v2494_v62 = vsel %vm1208_vm15, %v2920_v12, %v2924_v53  ;;  %v2504_v45 = vadd.f32 %v2498_v9, %v3844_v11  ;;  %2514 = vst [vmem:[#allocation6 + $0x18] sm:$0xff] %v2508_v37  ;;  %v4178_v11 = vld [vmem:[#allocation17_spill] sm:$0xff] }
 0x242   :  { %v2483_v30 = vsel %vm1236_vm1, %v2926_v42, %v4035_v1  ;;  %2488 = vst [vmem:[#allocation5 + $0x50] sm:$0xff] %v2482_v0  ;;  %v2495_v25 = vsel %vm1208_vm15, %v2922_v40, %v2926_v42  ;;  %v2500_v35 = vadd.f32 %v2494_v62, %v3892_v3  ;;  %v2509_v22 = vmul.f32 %v2503_v14, %v4058_v58 }
 0x243   :  { %2517 = vst [vmem:[#allocation6 + $0x48] sm:$0xff] %v2511_v16  ;;  %2489 = vst [vmem:[#allocation5 + $0x58] sm:$0xff] %v2483_v30  ;;  %v2501_v26 = vadd.f32 %v2495_v25, %v4178_v11  ;;  %v2510_v15 = vmul.f32 %v2504_v45, %v4058_v58 }
 0x244   :  { %v2506_v27 = vadd.f32 %v2500_v35, %v4053_v8  ;;  %2515 = vst [vmem:[#allocation6 + $0x20] sm:$0xff] %v2509_v22 }
 0x245   :  { %2960 = shalt.err (!%p2957_p12)
}
 0x246   :  { %s2961_s0 = scalar_lea.hbm %s4160_s6, 1536 }
 0x247   :  { %p2962_p13 = scmp.ne.s32.totalorder %s4160_s6, %s2961_s0  ;;  %p2965_p0 = scmp.lt.u32.totalorder %s2961_s0, %s4160_s6 }
 0x249   :  { %p2967_p1 = pnand %p2965_p0, %p2962_p13 }
 0x24b   :  { %2970 = shalt.err (!%p2967_p1)
}
 0x24c   :  { %s3015_s1 = smov 768   ;;  %s3016_s19 = smov 48   ;;  %v2507_v17 = vadd.f32 %v2501_v26, %v4056_v7  ;;  %2516 = vst [vmem:[#allocation6 + $0x28] sm:$0xff] %v2510_v15  ;;  %v2512_v3 = vmul.f32 %v2506_v27, %v4071_v32 }
 0x24d   :  { %2531 = dma.vmem_to_hbm [thread:$0]  %s4110_s4, 1536, %s4160_s6, [#allocation4], %s3015_s1, %s3015_s1, %s3016_s19  }
 0x24e   :  { %v2513_v1 = vmul.f32 %v2507_v17, %v4071_v32  ;;  %2518 = vst [vmem:[#allocation6 + $0x50] sm:$0xff] %v2512_v3  ;;  %s2971_s22 = scalar_lea.vmem %s2538_s11, 1536  ;;  %p2976_p3 = scmp.lt.s32.totalorder %s2538_s11, %s2538_s11 }
 0x24f   :  { %p2972_p2 = scmp.ne.s32.totalorder %s2538_s11, %s2971_s22  ;;  %p2977_p4 = scmp.lt.s32.totalorder %s2971_s22, %s2971_s22 }
 0x250   :  { %2519 = vst [vmem:[#allocation6 + $0x58] sm:$0xff] %v2513_v1 }
 0x251   :  { %p2978_p5 = por %p2977_p4, %p2976_p3 }
 0x253   :  { %p2979_p6 = pnand %p2978_p5, %p2972_p2 }
 0x255   :  { %2982 = shalt.err (!%p2979_p6)
}
 0x256   :  { %s2983_s6 = scalar_lea.hbm %s4161_s7, 1536 }
 0x257   :  { %p2984_p7 = scmp.ne.s32.totalorder %s4161_s7, %s2983_s6  ;;  %p2987_p8 = scmp.lt.u32.totalorder %s2983_s6, %s4161_s7 }
 0x259   :  { %p2989_p9 = pnand %p2987_p8, %p2984_p7 }
 0x25b   :  { %2992 = shalt.err (!%p2989_p9)
}
 0x25c   :  { %2543 = dma.vmem_to_hbm [thread:$0]  %s2538_s11, 1536, %s4161_s7, [#allocation7], %s3015_s1, %s3015_s1, %s3016_s19  }
 0x25d   :  { %2995 = dma.done.wait [#allocation4], 1536  }
 0x25e   :  { %2996 = vsyncadd [#allocation4], 4294965760 }
 0x25f   :  { %2997 = dma.done.wait [#allocation7], 1536  }
 0x260   :  { %2998 = vsyncadd [#allocation7], 4294965760 }
 0x261   :  { %2550 = vsyncpa [#allocation3], 1 }
 0x262   :  { %2551 = vsyncpa [#allocation4], 1 }
 0x263   :  { %2552 = vsyncpa [#allocation7], 1 }

</bundles_post_ra>
